<compile_context>
chip_gen: v7x
topology: tpu7x:2x2x1
jax: 0.10.0
libtpu: 0.0.40
codegen_flags: <defaults>
</compile_context>

<pallas_src>
import functools

import jax
import jax.numpy as jnp
from jax.experimental import pallas as pl
from jax.experimental.pallas import tpu as pltpu


# -----------------------------------------------------------------------------
# Small-C kernel (VPU path): blocks are (C, ts, 128), scalar weights in SMEM.
# -----------------------------------------------------------------------------
def _fusion_kernel_vpu(num_inputs, C, rs, w_ref, bh_ref, bo_ref, fw_ref,
                       fb_ref, *refs):
    # w_ref : SMEM (num_inputs*C*C,)  softmax-scaled 1x1 weights, [i, co, ci]
    # bh_ref: SMEM (C,)               scaled bias of input 0 (F_high)
    # bo_ref: SMEM (C,)               sum of scaled biases of inputs >= 1
    # fw_ref: SMEM (C*C,)             fusion conv weight, [co, ci]
    # fb_ref: SMEM (C,)               fusion conv bias
    # refs  : num_inputs x VMEM (C, ts, 128) inputs, then the (C, ts, 128) out.
    x_refs = refs[:num_inputs]
    o_ref = refs[num_inputs]
    ts = o_ref.shape[1]

    # Process the block in sublane chunks of `rs` rows so the accumulator
    # working set (2*C + 1 slabs of (rs, 128)) stays vreg-resident.
    for r0 in range(0, ts, rs):
        sl = pl.ds(r0, rs)

        f_high = [None] * C
        f_other = [None] * C
        # Inputs outermost: every x slab is loaded exactly once.
        for i in range(num_inputs):
            acc = f_high if i == 0 else f_other
            base = i * C * C
            for ci in range(C):
                x_slab = x_refs[i][ci, sl, :]           # (rs, 128), dense
                for co in range(C):
                    term = x_slab * w_ref[base + co * C + ci]
                    acc[co] = term if acc[co] is None else acc[co] + term

        # attention = F_other * sigmoid(F_high)   (sigmoid -> EUP slot)
        att = []
        for c in range(C):
            fh = f_high[c] + bh_ref[c]
            if f_other[c] is None:                      # degenerate n == 1
                fo = jnp.zeros_like(fh) + bo_ref[c]
            else:
                fo = f_other[c] + bo_ref[c]
            att.append(fo * jax.nn.sigmoid(fh))

        # fusion 1x1 conv; store each output channel directly (lane-dense vst)
        for co in range(C):
            y = att[0] * fw_ref[co * C + 0]
            for ci in range(1, C):
                y = y + att[ci] * fw_ref[co * C + ci]
            y = y + fb_ref[co]
            o_ref[co, sl, :] = y.astype(o_ref.dtype)


# -----------------------------------------------------------------------------
# Real-channel-count kernel (MXU path): (C, TL) blocks, weights in VMEM.
# -----------------------------------------------------------------------------
def _fusion_kernel_mxu(num_inputs, w_ref, bh_ref, bo_ref, fw_ref, fb_ref,
                       *refs):
    # w_ref : VMEM (num_inputs, C, C) softmax-scaled 1x1 weights (Cout, Cin)
    # bh_ref: VMEM (C, 1)             scaled bias of input 0 (F_high), f32
    # bo_ref: VMEM (C, 1)             sum of scaled biases of inputs >= 1, f32
    # fw_ref: VMEM (C, C)             fusion conv weight (Cout, Cin)
    # fb_ref: VMEM (C, 1)             fusion conv bias, f32
    # refs  : num_inputs x VMEM (C, TL) inputs, then the (C, TL) output.
    x_refs = refs[:num_inputs]
    o_ref = refs[num_inputs]
    dt = x_refs[0].dtype

    f_high = jnp.dot(w_ref[0], x_refs[0][...],
                     preferred_element_type=jnp.float32) + bh_ref[...]
    if num_inputs > 1:
        f_other = jnp.dot(w_ref[1], x_refs[1][...],
                          preferred_element_type=jnp.float32)
        for i in range(2, num_inputs):
            f_other = f_other + jnp.dot(w_ref[i], x_refs[i][...],
                                        preferred_element_type=jnp.float32)
        f_other = f_other + bo_ref[...]
    else:
        f_other = jnp.zeros_like(f_high) + bo_ref[...]

    att = f_other * jax.nn.sigmoid(f_high)              # sigmoid -> EUP
    out = jnp.dot(fw_ref[...], att.astype(dt),
                  preferred_element_type=jnp.float32) + fb_ref[...]
    o_ref[...] = out.astype(o_ref.dtype)


# -----------------------------------------------------------------------------
# Wrapper
# -----------------------------------------------------------------------------
def _largest_divisor_tile(total, max_tile, quantum):
    """Largest divisor of `total` that is a multiple of `quantum` and
    <= max_tile; falls back to `total` itself (one full tile) so the block
    shape is always legal and no padding is ever required."""
    if total <= max_tile:
        return total
    start = (max_tile // quantum) * quantum
    for t in range(start, 0, -quantum):
        if total % t == 0:
            return t
    return total


def fusion_block_pallas(inputs, params):
    """FusionBlock forward (matches the PyTorch module).

    inputs: list of NCHW arrays, all the same shape/dtype (N, C, H, W).
    params:
      'mix_weights': (num_inputs,)        softmax logits
      'conv_w'     : (num_inputs, C, C)   per-input 1x1 conv, (Cout, Cin)
      'conv_b'     : (num_inputs, C)
      'fusion_w'   : (C, C)               (Cout, Cin)
      'fusion_b'   : (C,)
    """
    num_inputs = len(inputs)
    N, C, H, W = inputs[0].shape
    HW = H * W
    dt = inputs[0].dtype
    itemsize = jnp.dtype(dt).itemsize

    # ---- glue: softmax over mixing logits, folded into 1x1 weights/biases.
    sw = jax.nn.softmax(params["mix_weights"].astype(jnp.float32), axis=0)
    w_scaled = params["conv_w"].astype(jnp.float32) * sw[:, None, None]
    b_scaled = params["conv_b"].astype(jnp.float32) * sw[:, None]
    b_high = b_scaled[0]
    if num_inputs > 1:
        b_other = jnp.sum(b_scaled[1:], axis=0)
    else:
        b_other = jnp.zeros((C,), jnp.float32)
    fw = params["fusion_w"].astype(jnp.float32)
    fb = params["fusion_b"].astype(jnp.float32)

    # ~12 MiB of block data per buffer set -> <= ~24 MiB double-buffered:
    # fits v7x's 64 MiB VMEM with headroom, well under v5e/v6e's 128 MiB.
    budget_bytes = 12 * 1024 * 1024

    use_mxu = (C >= 16) or (HW % 128 != 0)

    if use_mxu:
        # ---------------- MXU path: (C, TL) blocks + jnp.dot ----------------
        xs = [x.reshape(N, C, HW) for x in inputs]           # free reshape
        per_lane = (num_inputs + 1) * C * itemsize
        max_tile = max(128, (budget_bytes // per_lane) // 128 * 128)
        tile_hw = _largest_divisor_tile(HW, max_tile, 128)   # no padding
        n_t = HW // tile_hw

        w_in = w_scaled.astype(dt)                           # (n, C, C)
        fw_in = fw.astype(dt)                                # (C, C)
        bh_in = b_high.reshape(C, 1)
        bo_in = b_other.reshape(C, 1)
        fb_in = fb.reshape(C, 1)

        def full_spec(shape):
            nd = len(shape)
            return pl.BlockSpec(shape, lambda n, t: (0,) * nd)

        data_spec = pl.BlockSpec((None, C, tile_hw), lambda n, t: (n, 0, t))
        out_spec = pl.BlockSpec((None, C, tile_hw), lambda n, t: (n, 0, t))

        step_bytes = (num_inputs + 1) * C * tile_hw * itemsize
        w_bytes = (w_in.size + fw_in.size) * itemsize + 3 * C * 4
        vmem_limit = int(min(48 * 1024 * 1024,
                             max(32 * 1024 * 1024,
                                 2 * step_bytes + w_bytes + (4 << 20))))

        out = pl.pallas_call(
            functools.partial(_fusion_kernel_mxu, num_inputs),
            out_shape=jax.ShapeDtypeStruct((N, C, HW), dt),
            grid=(N, n_t),
            in_specs=[full_spec(tuple(w_in.shape)), full_spec((C, 1)),
                      full_spec((C, 1)), full_spec((C, C)),
                      full_spec((C, 1))] + [data_spec] * num_inputs,
            out_specs=out_spec,
            compiler_params=pltpu.CompilerParams(
                dimension_semantics=("parallel", "parallel"),
                vmem_limit_bytes=vmem_limit),
        )(w_in, bh_in, bo_in, fw_in, fb_in, *xs)
        return out.reshape(N, C, H, W)

    # ------------- small-C path: (C, ts, 128) blocks, VPU FMAs --------------
    S = HW // 128
    xs = [x.reshape(N, C, S, 128) for x in inputs]           # free reshape
    per_row = (num_inputs + 1) * C * 128 * itemsize
    max_ts = max(1, budget_bytes // per_row)
    ts = _largest_divisor_tile(S, max_ts, 8)                 # no padding
    rs = 8 if ts % 8 == 0 else ts                            # sublane chunk
    n_t = S // ts

    data_spec = pl.BlockSpec((None, C, ts, 128), lambda n, t: (n, 0, t, 0))
    smem_spec = pl.BlockSpec(memory_space=pltpu.MemorySpace.SMEM)

    step_bytes = (num_inputs + 1) * C * ts * 128 * itemsize
    vmem_limit = int(min(48 * 1024 * 1024,
                         max(32 * 1024 * 1024, 2 * step_bytes + (4 << 20))))

    out = pl.pallas_call(
        functools.partial(_fusion_kernel_vpu, num_inputs, C, rs),
        out_shape=jax.ShapeDtypeStruct((N, C, S, 128), dt),
        grid=(N, n_t),
        in_specs=[smem_spec] * 5 + [data_spec] * num_inputs,
        out_specs=pl.BlockSpec((None, C, ts, 128), lambda n, t: (n, 0, t, 0)),
        compiler_params=pltpu.CompilerParams(
            dimension_semantics=("parallel", "parallel"),
            vmem_limit_bytes=vmem_limit),
    )(w_scaled.reshape(-1), b_high, b_other, fw.reshape(-1), fb, *xs)
    return out.reshape(N, C, H, W)


# -----------------------------------------------------------------------------
# Pure-JAX reference (mirrors the PyTorch FusionBlock exactly)
# -----------------------------------------------------------------------------
def fusion_block_ref(inputs, params):
    sw = jax.nn.softmax(params["mix_weights"].astype(jnp.float32), axis=0)

    def conv1x1(x_nchw, w, b):  # w: (Cout, Cin), b: (Cout,)
        y = jnp.einsum("nchw,oc->nohw", x_nchw.astype(jnp.float32), w)
        return y + b[None, :, None, None]

    weighted = [
        sw[i] * conv1x1(inputs[i],
                        params["conv_w"][i].astype(jnp.float32),
                        params["conv_b"][i].astype(jnp.float32))
        for i in range(len(inputs))
    ]
    wsum = functools.reduce(lambda a, b: a + b, weighted)
    f_high = weighted[0]
    f_other = wsum - f_high
    attention = f_other * jax.nn.sigmoid(f_high)
    return conv1x1(attention, params["fusion_w"].astype(jnp.float32),
                   params["fusion_b"].astype(jnp.float32))


# -----------------------------------------------------------------------------
# Main
# -----------------------------------------------------------------------------
def _make_test_case(key, num_inputs, C, N, H, W):
    keys = jax.random.split(key, 5)
    params = {
        # nn.Parameter(torch.ones(num_inputs))
        "mix_weights": jnp.ones((num_inputs,), jnp.float32),
        "conv_w": 0.1 * jax.random.normal(keys[0], (num_inputs, C, C),
                                          jnp.float32),
        "conv_b": 0.05 * jax.random.normal(keys[1], (num_inputs, C),
                                           jnp.float32),
        "fusion_w": 0.1 * jax.random.normal(keys[2], (C, C), jnp.float32),
        "fusion_b": 0.05 * jax.random.normal(keys[3], (C,), jnp.float32),
    }
    in_keys = jax.random.split(keys[4], num_inputs)
    inputs = [jax.random.normal(in_keys[i], (N, C, H, W), jnp.float32)
              for i in range(num_inputs)]
    return inputs, params


if __name__ == "__main__":
    key = jax.random.PRNGKey(0)
    k1, k2 = jax.random.split(key)

    # --- small-C configuration (exercises the sublane-dense VPU path) -------
    inputs, params = _make_test_case(k1, num_inputs=4, C=4, N=2, H=16, W=16)
    out = jax.block_until_ready(fusion_block_pallas(inputs, params))
    ref = jax.block_until_ready(fusion_block_ref(inputs, params))
    assert out.shape == (2, 4, 16, 16)
    assert jnp.allclose(out, ref, atol=1e-5, rtol=1e-5), \
        float(jnp.max(jnp.abs(out - ref)))

    # --- real ModifiedUNet channel count (exercises the MXU path) -----------
    inputs2, params2 = _make_test_case(k2, num_inputs=4, C=32, N=2, H=16, W=16)
    out2 = jax.block_until_ready(fusion_block_pallas(inputs2, params2))
    ref2 = jax.block_until_ready(fusion_block_ref(inputs2, params2))
    assert out2.shape == (2, 32, 16, 16)
    # MXU f32 matmuls may use a different pass precision than XLA's einsum.
    assert jnp.allclose(out2, ref2, atol=5e-3, rtol=5e-3), \
        float(jnp.max(jnp.abs(out2 - ref2)))

    print("KERNEL_OK")
</pallas_src>

<mosaic_0001>
module attributes {stable_mosaic.version = 11 : i64} {
  func.func @_fusion_kernel_vpu(%arg0: i32, %arg1: i32, %arg2: memref<64xf32, #tpu.memory_space<smem>>, %arg3: memref<4xf32, #tpu.memory_space<smem>>, %arg4: memref<4xf32, #tpu.memory_space<smem>>, %arg5: memref<16xf32, #tpu.memory_space<smem>>, %arg6: memref<4xf32, #tpu.memory_space<smem>>, %arg7: memref<1x4x2x128xf32, #tpu.memory_space<vmem>>, %arg8: memref<1x4x2x128xf32, #tpu.memory_space<vmem>>, %arg9: memref<1x4x2x128xf32, #tpu.memory_space<vmem>>, %arg10: memref<1x4x2x128xf32, #tpu.memory_space<vmem>>, %arg11: memref<1x4x2x128xf32, #tpu.memory_space<vmem>>) attributes {dimension_semantics = [#tpu.dimension_semantics<parallel>, #tpu.dimension_semantics<parallel>], iteration_bounds = array<i64: 2, 1>, scalar_prefetch = 0 : i64, scratch_operands = 0 : i64, tpu.core_type = #tpu.core_type<tc>, window_params = [{transform_indices = @transform_0, window_bounds = array<i64: 64>}, {transform_indices = @transform_1, window_bounds = array<i64: 4>}, {transform_indices = @transform_2, window_bounds = array<i64: 4>}, {transform_indices = @transform_3, window_bounds = array<i64: 16>}, {transform_indices = @transform_4, window_bounds = array<i64: 4>}, {transform_indices = @transform_5, window_bounds = array<i64: 1, 4, 2, 128>}, {transform_indices = @transform_6, window_bounds = array<i64: 1, 4, 2, 128>}, {transform_indices = @transform_7, window_bounds = array<i64: 1, 4, 2, 128>}, {transform_indices = @transform_8, window_bounds = array<i64: 1, 4, 2, 128>}, {transform_indices = @transform_9, window_bounds = array<i64: 1, 4, 2, 128>}]} {
    %c0 = arith.constant 0 : index
    %c0_0 = arith.constant 0 : index
    %c0_1 = arith.constant 0 : index
    %c0_2 = arith.constant 0 : index
    %0 = vector.load %arg7[%c0, %c0_0, %c0_1, %c0_2] : memref<1x4x2x128xf32, #tpu.memory_space<vmem>>, vector<1x1x2x128xf32>
    %1 = vector.shape_cast %0 : vector<1x1x2x128xf32> to vector<2x128xf32>
    %c0_3 = arith.constant 0 : index
    %2 = memref.load %arg2[%c0_3] : memref<64xf32, #tpu.memory_space<smem>>
    %3 = vector.broadcast %2 : f32 to vector<2x128xf32>
    %4 = arith.mulf %1, %3 : vector<2x128xf32>
    %c4 = arith.constant 4 : index
    %5 = memref.load %arg2[%c4] : memref<64xf32, #tpu.memory_space<smem>>
    %6 = vector.broadcast %5 : f32 to vector<2x128xf32>
    %7 = arith.mulf %1, %6 : vector<2x128xf32>
    %c8 = arith.constant 8 : index
    %8 = memref.load %arg2[%c8] : memref<64xf32, #tpu.memory_space<smem>>
    %9 = vector.broadcast %8 : f32 to vector<2x128xf32>
    %10 = arith.mulf %1, %9 : vector<2x128xf32>
    %c12 = arith.constant 12 : index
    %11 = memref.load %arg2[%c12] : memref<64xf32, #tpu.memory_space<smem>>
    %12 = vector.broadcast %11 : f32 to vector<2x128xf32>
    %13 = arith.mulf %1, %12 : vector<2x128xf32>
    %c0_4 = arith.constant 0 : index
    %c1 = arith.constant 1 : index
    %c0_5 = arith.constant 0 : index
    %c0_6 = arith.constant 0 : index
    %14 = vector.load %arg7[%c0_4, %c1, %c0_5, %c0_6] : memref<1x4x2x128xf32, #tpu.memory_space<vmem>>, vector<1x1x2x128xf32>
    %15 = vector.shape_cast %14 : vector<1x1x2x128xf32> to vector<2x128xf32>
    %c1_7 = arith.constant 1 : index
    %16 = memref.load %arg2[%c1_7] : memref<64xf32, #tpu.memory_space<smem>>
    %17 = vector.broadcast %16 : f32 to vector<2x128xf32>
    %18 = arith.mulf %15, %17 : vector<2x128xf32>
    %19 = arith.addf %4, %18 : vector<2x128xf32>
    %c5 = arith.constant 5 : index
    %20 = memref.load %arg2[%c5] : memref<64xf32, #tpu.memory_space<smem>>
    %21 = vector.broadcast %20 : f32 to vector<2x128xf32>
    %22 = arith.mulf %15, %21 : vector<2x128xf32>
    %23 = arith.addf %7, %22 : vector<2x128xf32>
    %c9 = arith.constant 9 : index
    %24 = memref.load %arg2[%c9] : memref<64xf32, #tpu.memory_space<smem>>
    %25 = vector.broadcast %24 : f32 to vector<2x128xf32>
    %26 = arith.mulf %15, %25 : vector<2x128xf32>
    %27 = arith.addf %10, %26 : vector<2x128xf32>
    %c13 = arith.constant 13 : index
    %28 = memref.load %arg2[%c13] : memref<64xf32, #tpu.memory_space<smem>>
    %29 = vector.broadcast %28 : f32 to vector<2x128xf32>
    %30 = arith.mulf %15, %29 : vector<2x128xf32>
    %31 = arith.addf %13, %30 : vector<2x128xf32>
    %c0_8 = arith.constant 0 : index
    %c2 = arith.constant 2 : index
    %c0_9 = arith.constant 0 : index
    %c0_10 = arith.constant 0 : index
    %32 = vector.load %arg7[%c0_8, %c2, %c0_9, %c0_10] : memref<1x4x2x128xf32, #tpu.memory_space<vmem>>, vector<1x1x2x128xf32>
    %33 = vector.shape_cast %32 : vector<1x1x2x128xf32> to vector<2x128xf32>
    %c2_11 = arith.constant 2 : index
    %34 = memref.load %arg2[%c2_11] : memref<64xf32, #tpu.memory_space<smem>>
    %35 = vector.broadcast %34 : f32 to vector<2x128xf32>
    %36 = arith.mulf %33, %35 : vector<2x128xf32>
    %37 = arith.addf %19, %36 : vector<2x128xf32>
    %c6 = arith.constant 6 : index
    %38 = memref.load %arg2[%c6] : memref<64xf32, #tpu.memory_space<smem>>
    %39 = vector.broadcast %38 : f32 to vector<2x128xf32>
    %40 = arith.mulf %33, %39 : vector<2x128xf32>
    %41 = arith.addf %23, %40 : vector<2x128xf32>
    %c10 = arith.constant 10 : index
    %42 = memref.load %arg2[%c10] : memref<64xf32, #tpu.memory_space<smem>>
    %43 = vector.broadcast %42 : f32 to vector<2x128xf32>
    %44 = arith.mulf %33, %43 : vector<2x128xf32>
    %45 = arith.addf %27, %44 : vector<2x128xf32>
    %c14 = arith.constant 14 : index
    %46 = memref.load %arg2[%c14] : memref<64xf32, #tpu.memory_space<smem>>
    %47 = vector.broadcast %46 : f32 to vector<2x128xf32>
    %48 = arith.mulf %33, %47 : vector<2x128xf32>
    %49 = arith.addf %31, %48 : vector<2x128xf32>
    %c0_12 = arith.constant 0 : index
    %c3 = arith.constant 3 : index
    %c0_13 = arith.constant 0 : index
    %c0_14 = arith.constant 0 : index
    %50 = vector.load %arg7[%c0_12, %c3, %c0_13, %c0_14] : memref<1x4x2x128xf32, #tpu.memory_space<vmem>>, vector<1x1x2x128xf32>
    %51 = vector.shape_cast %50 : vector<1x1x2x128xf32> to vector<2x128xf32>
    %c3_15 = arith.constant 3 : index
    %52 = memref.load %arg2[%c3_15] : memref<64xf32, #tpu.memory_space<smem>>
    %53 = vector.broadcast %52 : f32 to vector<2x128xf32>
    %54 = arith.mulf %51, %53 : vector<2x128xf32>
    %55 = arith.addf %37, %54 : vector<2x128xf32>
    %c7 = arith.constant 7 : index
    %56 = memref.load %arg2[%c7] : memref<64xf32, #tpu.memory_space<smem>>
    %57 = vector.broadcast %56 : f32 to vector<2x128xf32>
    %58 = arith.mulf %51, %57 : vector<2x128xf32>
    %59 = arith.addf %41, %58 : vector<2x128xf32>
    %c11 = arith.constant 11 : index
    %60 = memref.load %arg2[%c11] : memref<64xf32, #tpu.memory_space<smem>>
    %61 = vector.broadcast %60 : f32 to vector<2x128xf32>
    %62 = arith.mulf %51, %61 : vector<2x128xf32>
    %63 = arith.addf %45, %62 : vector<2x128xf32>
    %c15 = arith.constant 15 : index
    %64 = memref.load %arg2[%c15] : memref<64xf32, #tpu.memory_space<smem>>
    %65 = vector.broadcast %64 : f32 to vector<2x128xf32>
    %66 = arith.mulf %51, %65 : vector<2x128xf32>
    %67 = arith.addf %49, %66 : vector<2x128xf32>
    %c0_16 = arith.constant 0 : index
    %c0_17 = arith.constant 0 : index
    %c0_18 = arith.constant 0 : index
    %c0_19 = arith.constant 0 : index
    %68 = vector.load %arg8[%c0_16, %c0_17, %c0_18, %c0_19] : memref<1x4x2x128xf32, #tpu.memory_space<vmem>>, vector<1x1x2x128xf32>
    %69 = vector.shape_cast %68 : vector<1x1x2x128xf32> to vector<2x128xf32>
    %c16 = arith.constant 16 : index
    %70 = memref.load %arg2[%c16] : memref<64xf32, #tpu.memory_space<smem>>
    %71 = vector.broadcast %70 : f32 to vector<2x128xf32>
    %72 = arith.mulf %69, %71 : vector<2x128xf32>
    %c20 = arith.constant 20 : index
    %73 = memref.load %arg2[%c20] : memref<64xf32, #tpu.memory_space<smem>>
    %74 = vector.broadcast %73 : f32 to vector<2x128xf32>
    %75 = arith.mulf %69, %74 : vector<2x128xf32>
    %c24 = arith.constant 24 : index
    %76 = memref.load %arg2[%c24] : memref<64xf32, #tpu.memory_space<smem>>
    %77 = vector.broadcast %76 : f32 to vector<2x128xf32>
    %78 = arith.mulf %69, %77 : vector<2x128xf32>
    %c28 = arith.constant 28 : index
    %79 = memref.load %arg2[%c28] : memref<64xf32, #tpu.memory_space<smem>>
    %80 = vector.broadcast %79 : f32 to vector<2x128xf32>
    %81 = arith.mulf %69, %80 : vector<2x128xf32>
    %c0_20 = arith.constant 0 : index
    %c1_21 = arith.constant 1 : index
    %c0_22 = arith.constant 0 : index
    %c0_23 = arith.constant 0 : index
    %82 = vector.load %arg8[%c0_20, %c1_21, %c0_22, %c0_23] : memref<1x4x2x128xf32, #tpu.memory_space<vmem>>, vector<1x1x2x128xf32>
    %83 = vector.shape_cast %82 : vector<1x1x2x128xf32> to vector<2x128xf32>
    %c17 = arith.constant 17 : index
    %84 = memref.load %arg2[%c17] : memref<64xf32, #tpu.memory_space<smem>>
    %85 = vector.broadcast %84 : f32 to vector<2x128xf32>
    %86 = arith.mulf %83, %85 : vector<2x128xf32>
    %87 = arith.addf %72, %86 : vector<2x128xf32>
    %c21 = arith.constant 21 : index
    %88 = memref.load %arg2[%c21] : memref<64xf32, #tpu.memory_space<smem>>
    %89 = vector.broadcast %88 : f32 to vector<2x128xf32>
    %90 = arith.mulf %83, %89 : vector<2x128xf32>
    %91 = arith.addf %75, %90 : vector<2x128xf32>
    %c25 = arith.constant 25 : index
    %92 = memref.load %arg2[%c25] : memref<64xf32, #tpu.memory_space<smem>>
    %93 = vector.broadcast %92 : f32 to vector<2x128xf32>
    %94 = arith.mulf %83, %93 : vector<2x128xf32>
    %95 = arith.addf %78, %94 : vector<2x128xf32>
    %c29 = arith.constant 29 : index
    %96 = memref.load %arg2[%c29] : memref<64xf32, #tpu.memory_space<smem>>
    %97 = vector.broadcast %96 : f32 to vector<2x128xf32>
    %98 = arith.mulf %83, %97 : vector<2x128xf32>
    %99 = arith.addf %81, %98 : vector<2x128xf32>
    %c0_24 = arith.constant 0 : index
    %c2_25 = arith.constant 2 : index
    %c0_26 = arith.constant 0 : index
    %c0_27 = arith.constant 0 : index
    %100 = vector.load %arg8[%c0_24, %c2_25, %c0_26, %c0_27] : memref<1x4x2x128xf32, #tpu.memory_space<vmem>>, vector<1x1x2x128xf32>
    %101 = vector.shape_cast %100 : vector<1x1x2x128xf32> to vector<2x128xf32>
    %c18 = arith.constant 18 : index
    %102 = memref.load %arg2[%c18] : memref<64xf32, #tpu.memory_space<smem>>
    %103 = vector.broadcast %102 : f32 to vector<2x128xf32>
    %104 = arith.mulf %101, %103 : vector<2x128xf32>
    %105 = arith.addf %87, %104 : vector<2x128xf32>
    %c22 = arith.constant 22 : index
    %106 = memref.load %arg2[%c22] : memref<64xf32, #tpu.memory_space<smem>>
    %107 = vector.broadcast %106 : f32 to vector<2x128xf32>
    %108 = arith.mulf %101, %107 : vector<2x128xf32>
    %109 = arith.addf %91, %108 : vector<2x128xf32>
    %c26 = arith.constant 26 : index
    %110 = memref.load %arg2[%c26] : memref<64xf32, #tpu.memory_space<smem>>
    %111 = vector.broadcast %110 : f32 to vector<2x128xf32>
    %112 = arith.mulf %101, %111 : vector<2x128xf32>
    %113 = arith.addf %95, %112 : vector<2x128xf32>
    %c30 = arith.constant 30 : index
    %114 = memref.load %arg2[%c30] : memref<64xf32, #tpu.memory_space<smem>>
    %115 = vector.broadcast %114 : f32 to vector<2x128xf32>
    %116 = arith.mulf %101, %115 : vector<2x128xf32>
    %117 = arith.addf %99, %116 : vector<2x128xf32>
    %c0_28 = arith.constant 0 : index
    %c3_29 = arith.constant 3 : index
    %c0_30 = arith.constant 0 : index
    %c0_31 = arith.constant 0 : index
    %118 = vector.load %arg8[%c0_28, %c3_29, %c0_30, %c0_31] : memref<1x4x2x128xf32, #tpu.memory_space<vmem>>, vector<1x1x2x128xf32>
    %119 = vector.shape_cast %118 : vector<1x1x2x128xf32> to vector<2x128xf32>
    %c19 = arith.constant 19 : index
    %120 = memref.load %arg2[%c19] : memref<64xf32, #tpu.memory_space<smem>>
    %121 = vector.broadcast %120 : f32 to vector<2x128xf32>
    %122 = arith.mulf %119, %121 : vector<2x128xf32>
    %123 = arith.addf %105, %122 : vector<2x128xf32>
    %c23 = arith.constant 23 : index
    %124 = memref.load %arg2[%c23] : memref<64xf32, #tpu.memory_space<smem>>
    %125 = vector.broadcast %124 : f32 to vector<2x128xf32>
    %126 = arith.mulf %119, %125 : vector<2x128xf32>
    %127 = arith.addf %109, %126 : vector<2x128xf32>
    %c27 = arith.constant 27 : index
    %128 = memref.load %arg2[%c27] : memref<64xf32, #tpu.memory_space<smem>>
    %129 = vector.broadcast %128 : f32 to vector<2x128xf32>
    %130 = arith.mulf %119, %129 : vector<2x128xf32>
    %131 = arith.addf %113, %130 : vector<2x128xf32>
    %c31 = arith.constant 31 : index
    %132 = memref.load %arg2[%c31] : memref<64xf32, #tpu.memory_space<smem>>
    %133 = vector.broadcast %132 : f32 to vector<2x128xf32>
    %134 = arith.mulf %119, %133 : vector<2x128xf32>
    %135 = arith.addf %117, %134 : vector<2x128xf32>
    %c0_32 = arith.constant 0 : index
    %c0_33 = arith.constant 0 : index
    %c0_34 = arith.constant 0 : index
    %c0_35 = arith.constant 0 : index
    %136 = vector.load %arg9[%c0_32, %c0_33, %c0_34, %c0_35] : memref<1x4x2x128xf32, #tpu.memory_space<vmem>>, vector<1x1x2x128xf32>
    %137 = vector.shape_cast %136 : vector<1x1x2x128xf32> to vector<2x128xf32>
    %c32 = arith.constant 32 : index
    %138 = memref.load %arg2[%c32] : memref<64xf32, #tpu.memory_space<smem>>
    %139 = vector.broadcast %138 : f32 to vector<2x128xf32>
    %140 = arith.mulf %137, %139 : vector<2x128xf32>
    %141 = arith.addf %123, %140 : vector<2x128xf32>
    %c36 = arith.constant 36 : index
    %142 = memref.load %arg2[%c36] : memref<64xf32, #tpu.memory_space<smem>>
    %143 = vector.broadcast %142 : f32 to vector<2x128xf32>
    %144 = arith.mulf %137, %143 : vector<2x128xf32>
    %145 = arith.addf %127, %144 : vector<2x128xf32>
    %c40 = arith.constant 40 : index
    %146 = memref.load %arg2[%c40] : memref<64xf32, #tpu.memory_space<smem>>
    %147 = vector.broadcast %146 : f32 to vector<2x128xf32>
    %148 = arith.mulf %137, %147 : vector<2x128xf32>
    %149 = arith.addf %131, %148 : vector<2x128xf32>
    %c44 = arith.constant 44 : index
    %150 = memref.load %arg2[%c44] : memref<64xf32, #tpu.memory_space<smem>>
    %151 = vector.broadcast %150 : f32 to vector<2x128xf32>
    %152 = arith.mulf %137, %151 : vector<2x128xf32>
    %153 = arith.addf %135, %152 : vector<2x128xf32>
    %c0_36 = arith.constant 0 : index
    %c1_37 = arith.constant 1 : index
    %c0_38 = arith.constant 0 : index
    %c0_39 = arith.constant 0 : index
    %154 = vector.load %arg9[%c0_36, %c1_37, %c0_38, %c0_39] : memref<1x4x2x128xf32, #tpu.memory_space<vmem>>, vector<1x1x2x128xf32>
    %155 = vector.shape_cast %154 : vector<1x1x2x128xf32> to vector<2x128xf32>
    %c33 = arith.constant 33 : index
    %156 = memref.load %arg2[%c33] : memref<64xf32, #tpu.memory_space<smem>>
    %157 = vector.broadcast %156 : f32 to vector<2x128xf32>
    %158 = arith.mulf %155, %157 : vector<2x128xf32>
    %159 = arith.addf %141, %158 : vector<2x128xf32>
    %c37 = arith.constant 37 : index
    %160 = memref.load %arg2[%c37] : memref<64xf32, #tpu.memory_space<smem>>
    %161 = vector.broadcast %160 : f32 to vector<2x128xf32>
    %162 = arith.mulf %155, %161 : vector<2x128xf32>
    %163 = arith.addf %145, %162 : vector<2x128xf32>
    %c41 = arith.constant 41 : index
    %164 = memref.load %arg2[%c41] : memref<64xf32, #tpu.memory_space<smem>>
    %165 = vector.broadcast %164 : f32 to vector<2x128xf32>
    %166 = arith.mulf %155, %165 : vector<2x128xf32>
    %167 = arith.addf %149, %166 : vector<2x128xf32>
    %c45 = arith.constant 45 : index
    %168 = memref.load %arg2[%c45] : memref<64xf32, #tpu.memory_space<smem>>
    %169 = vector.broadcast %168 : f32 to vector<2x128xf32>
    %170 = arith.mulf %155, %169 : vector<2x128xf32>
    %171 = arith.addf %153, %170 : vector<2x128xf32>
    %c0_40 = arith.constant 0 : index
    %c2_41 = arith.constant 2 : index
    %c0_42 = arith.constant 0 : index
    %c0_43 = arith.constant 0 : index
    %172 = vector.load %arg9[%c0_40, %c2_41, %c0_42, %c0_43] : memref<1x4x2x128xf32, #tpu.memory_space<vmem>>, vector<1x1x2x128xf32>
    %173 = vector.shape_cast %172 : vector<1x1x2x128xf32> to vector<2x128xf32>
    %c34 = arith.constant 34 : index
    %174 = memref.load %arg2[%c34] : memref<64xf32, #tpu.memory_space<smem>>
    %175 = vector.broadcast %174 : f32 to vector<2x128xf32>
    %176 = arith.mulf %173, %175 : vector<2x128xf32>
    %177 = arith.addf %159, %176 : vector<2x128xf32>
    %c38 = arith.constant 38 : index
    %178 = memref.load %arg2[%c38] : memref<64xf32, #tpu.memory_space<smem>>
    %179 = vector.broadcast %178 : f32 to vector<2x128xf32>
    %180 = arith.mulf %173, %179 : vector<2x128xf32>
    %181 = arith.addf %163, %180 : vector<2x128xf32>
    %c42 = arith.constant 42 : index
    %182 = memref.load %arg2[%c42] : memref<64xf32, #tpu.memory_space<smem>>
    %183 = vector.broadcast %182 : f32 to vector<2x128xf32>
    %184 = arith.mulf %173, %183 : vector<2x128xf32>
    %185 = arith.addf %167, %184 : vector<2x128xf32>
    %c46 = arith.constant 46 : index
    %186 = memref.load %arg2[%c46] : memref<64xf32, #tpu.memory_space<smem>>
    %187 = vector.broadcast %186 : f32 to vector<2x128xf32>
    %188 = arith.mulf %173, %187 : vector<2x128xf32>
    %189 = arith.addf %171, %188 : vector<2x128xf32>
    %c0_44 = arith.constant 0 : index
    %c3_45 = arith.constant 3 : index
    %c0_46 = arith.constant 0 : index
    %c0_47 = arith.constant 0 : index
    %190 = vector.load %arg9[%c0_44, %c3_45, %c0_46, %c0_47] : memref<1x4x2x128xf32, #tpu.memory_space<vmem>>, vector<1x1x2x128xf32>
    %191 = vector.shape_cast %190 : vector<1x1x2x128xf32> to vector<2x128xf32>
    %c35 = arith.constant 35 : index
    %192 = memref.load %arg2[%c35] : memref<64xf32, #tpu.memory_space<smem>>
    %193 = vector.broadcast %192 : f32 to vector<2x128xf32>
    %194 = arith.mulf %191, %193 : vector<2x128xf32>
    %195 = arith.addf %177, %194 : vector<2x128xf32>
    %c39 = arith.constant 39 : index
    %196 = memref.load %arg2[%c39] : memref<64xf32, #tpu.memory_space<smem>>
    %197 = vector.broadcast %196 : f32 to vector<2x128xf32>
    %198 = arith.mulf %191, %197 : vector<2x128xf32>
    %199 = arith.addf %181, %198 : vector<2x128xf32>
    %c43 = arith.constant 43 : index
    %200 = memref.load %arg2[%c43] : memref<64xf32, #tpu.memory_space<smem>>
    %201 = vector.broadcast %200 : f32 to vector<2x128xf32>
    %202 = arith.mulf %191, %201 : vector<2x128xf32>
    %203 = arith.addf %185, %202 : vector<2x128xf32>
    %c47 = arith.constant 47 : index
    %204 = memref.load %arg2[%c47] : memref<64xf32, #tpu.memory_space<smem>>
    %205 = vector.broadcast %204 : f32 to vector<2x128xf32>
    %206 = arith.mulf %191, %205 : vector<2x128xf32>
    %207 = arith.addf %189, %206 : vector<2x128xf32>
    %c0_48 = arith.constant 0 : index
    %c0_49 = arith.constant 0 : index
    %c0_50 = arith.constant 0 : index
    %c0_51 = arith.constant 0 : index
    %208 = vector.load %arg10[%c0_48, %c0_49, %c0_50, %c0_51] : memref<1x4x2x128xf32, #tpu.memory_space<vmem>>, vector<1x1x2x128xf32>
    %209 = vector.shape_cast %208 : vector<1x1x2x128xf32> to vector<2x128xf32>
    %c48 = arith.constant 48 : index
    %210 = memref.load %arg2[%c48] : memref<64xf32, #tpu.memory_space<smem>>
    %211 = vector.broadcast %210 : f32 to vector<2x128xf32>
    %212 = arith.mulf %209, %211 : vector<2x128xf32>
    %213 = arith.addf %195, %212 : vector<2x128xf32>
    %c52 = arith.constant 52 : index
    %214 = memref.load %arg2[%c52] : memref<64xf32, #tpu.memory_space<smem>>
    %215 = vector.broadcast %214 : f32 to vector<2x128xf32>
    %216 = arith.mulf %209, %215 : vector<2x128xf32>
    %217 = arith.addf %199, %216 : vector<2x128xf32>
    %c56 = arith.constant 56 : index
    %218 = memref.load %arg2[%c56] : memref<64xf32, #tpu.memory_space<smem>>
    %219 = vector.broadcast %218 : f32 to vector<2x128xf32>
    %220 = arith.mulf %209, %219 : vector<2x128xf32>
    %221 = arith.addf %203, %220 : vector<2x128xf32>
    %c60 = arith.constant 60 : index
    %222 = memref.load %arg2[%c60] : memref<64xf32, #tpu.memory_space<smem>>
    %223 = vector.broadcast %222 : f32 to vector<2x128xf32>
    %224 = arith.mulf %209, %223 : vector<2x128xf32>
    %225 = arith.addf %207, %224 : vector<2x128xf32>
    %c0_52 = arith.constant 0 : index
    %c1_53 = arith.constant 1 : index
    %c0_54 = arith.constant 0 : index
    %c0_55 = arith.constant 0 : index
    %226 = vector.load %arg10[%c0_52, %c1_53, %c0_54, %c0_55] : memref<1x4x2x128xf32, #tpu.memory_space<vmem>>, vector<1x1x2x128xf32>
    %227 = vector.shape_cast %226 : vector<1x1x2x128xf32> to vector<2x128xf32>
    %c49 = arith.constant 49 : index
    %228 = memref.load %arg2[%c49] : memref<64xf32, #tpu.memory_space<smem>>
    %229 = vector.broadcast %228 : f32 to vector<2x128xf32>
    %230 = arith.mulf %227, %229 : vector<2x128xf32>
    %231 = arith.addf %213, %230 : vector<2x128xf32>
    %c53 = arith.constant 53 : index
    %232 = memref.load %arg2[%c53] : memref<64xf32, #tpu.memory_space<smem>>
    %233 = vector.broadcast %232 : f32 to vector<2x128xf32>
    %234 = arith.mulf %227, %233 : vector<2x128xf32>
    %235 = arith.addf %217, %234 : vector<2x128xf32>
    %c57 = arith.constant 57 : index
    %236 = memref.load %arg2[%c57] : memref<64xf32, #tpu.memory_space<smem>>
    %237 = vector.broadcast %236 : f32 to vector<2x128xf32>
    %238 = arith.mulf %227, %237 : vector<2x128xf32>
    %239 = arith.addf %221, %238 : vector<2x128xf32>
    %c61 = arith.constant 61 : index
    %240 = memref.load %arg2[%c61] : memref<64xf32, #tpu.memory_space<smem>>
    %241 = vector.broadcast %240 : f32 to vector<2x128xf32>
    %242 = arith.mulf %227, %241 : vector<2x128xf32>
    %243 = arith.addf %225, %242 : vector<2x128xf32>
    %c0_56 = arith.constant 0 : index
    %c2_57 = arith.constant 2 : index
    %c0_58 = arith.constant 0 : index
    %c0_59 = arith.constant 0 : index
    %244 = vector.load %arg10[%c0_56, %c2_57, %c0_58, %c0_59] : memref<1x4x2x128xf32, #tpu.memory_space<vmem>>, vector<1x1x2x128xf32>
    %245 = vector.shape_cast %244 : vector<1x1x2x128xf32> to vector<2x128xf32>
    %c50 = arith.constant 50 : index
    %246 = memref.load %arg2[%c50] : memref<64xf32, #tpu.memory_space<smem>>
    %247 = vector.broadcast %246 : f32 to vector<2x128xf32>
    %248 = arith.mulf %245, %247 : vector<2x128xf32>
    %249 = arith.addf %231, %248 : vector<2x128xf32>
    %c54 = arith.constant 54 : index
    %250 = memref.load %arg2[%c54] : memref<64xf32, #tpu.memory_space<smem>>
    %251 = vector.broadcast %250 : f32 to vector<2x128xf32>
    %252 = arith.mulf %245, %251 : vector<2x128xf32>
    %253 = arith.addf %235, %252 : vector<2x128xf32>
    %c58 = arith.constant 58 : index
    %254 = memref.load %arg2[%c58] : memref<64xf32, #tpu.memory_space<smem>>
    %255 = vector.broadcast %254 : f32 to vector<2x128xf32>
    %256 = arith.mulf %245, %255 : vector<2x128xf32>
    %257 = arith.addf %239, %256 : vector<2x128xf32>
    %c62 = arith.constant 62 : index
    %258 = memref.load %arg2[%c62] : memref<64xf32, #tpu.memory_space<smem>>
    %259 = vector.broadcast %258 : f32 to vector<2x128xf32>
    %260 = arith.mulf %245, %259 : vector<2x128xf32>
    %261 = arith.addf %243, %260 : vector<2x128xf32>
    %c0_60 = arith.constant 0 : index
    %c3_61 = arith.constant 3 : index
    %c0_62 = arith.constant 0 : index
    %c0_63 = arith.constant 0 : index
    %262 = vector.load %arg10[%c0_60, %c3_61, %c0_62, %c0_63] : memref<1x4x2x128xf32, #tpu.memory_space<vmem>>, vector<1x1x2x128xf32>
    %263 = vector.shape_cast %262 : vector<1x1x2x128xf32> to vector<2x128xf32>
    %c51 = arith.constant 51 : index
    %264 = memref.load %arg2[%c51] : memref<64xf32, #tpu.memory_space<smem>>
    %265 = vector.broadcast %264 : f32 to vector<2x128xf32>
    %266 = arith.mulf %263, %265 : vector<2x128xf32>
    %267 = arith.addf %249, %266 : vector<2x128xf32>
    %c55 = arith.constant 55 : index
    %268 = memref.load %arg2[%c55] : memref<64xf32, #tpu.memory_space<smem>>
    %269 = vector.broadcast %268 : f32 to vector<2x128xf32>
    %270 = arith.mulf %263, %269 : vector<2x128xf32>
    %271 = arith.addf %253, %270 : vector<2x128xf32>
    %c59 = arith.constant 59 : index
    %272 = memref.load %arg2[%c59] : memref<64xf32, #tpu.memory_space<smem>>
    %273 = vector.broadcast %272 : f32 to vector<2x128xf32>
    %274 = arith.mulf %263, %273 : vector<2x128xf32>
    %275 = arith.addf %257, %274 : vector<2x128xf32>
    %c63 = arith.constant 63 : index
    %276 = memref.load %arg2[%c63] : memref<64xf32, #tpu.memory_space<smem>>
    %277 = vector.broadcast %276 : f32 to vector<2x128xf32>
    %278 = arith.mulf %263, %277 : vector<2x128xf32>
    %279 = arith.addf %261, %278 : vector<2x128xf32>
    %c0_64 = arith.constant 0 : index
    %280 = memref.load %arg3[%c0_64] : memref<4xf32, #tpu.memory_space<smem>>
    %281 = vector.broadcast %280 : f32 to vector<2x128xf32>
    %282 = arith.addf %55, %281 : vector<2x128xf32>
    %c0_65 = arith.constant 0 : index
    %283 = memref.load %arg4[%c0_65] : memref<4xf32, #tpu.memory_space<smem>>
    %284 = vector.broadcast %283 : f32 to vector<2x128xf32>
    %285 = arith.addf %267, %284 : vector<2x128xf32>
    %286 = arith.negf %282 : vector<2x128xf32>
    %287 = math.exp %286 : vector<2x128xf32>
    %cst = arith.constant 1.000000e+00 : f32
    %288 = vector.broadcast %cst : f32 to vector<2x128xf32>
    %289 = arith.addf %288, %287 : vector<2x128xf32>
    %290 = arith.divf %288, %289 : vector<2x128xf32>
    %291 = arith.mulf %285, %290 : vector<2x128xf32>
    %c1_66 = arith.constant 1 : index
    %292 = memref.load %arg3[%c1_66] : memref<4xf32, #tpu.memory_space<smem>>
    %293 = vector.broadcast %292 : f32 to vector<2x128xf32>
    %294 = arith.addf %59, %293 : vector<2x128xf32>
    %c1_67 = arith.constant 1 : index
    %295 = memref.load %arg4[%c1_67] : memref<4xf32, #tpu.memory_space<smem>>
    %296 = vector.broadcast %295 : f32 to vector<2x128xf32>
    %297 = arith.addf %271, %296 : vector<2x128xf32>
    %298 = arith.negf %294 : vector<2x128xf32>
    %299 = math.exp %298 : vector<2x128xf32>
    %cst_68 = arith.constant 1.000000e+00 : f32
    %300 = vector.broadcast %cst_68 : f32 to vector<2x128xf32>
    %301 = arith.addf %300, %299 : vector<2x128xf32>
    %302 = arith.divf %300, %301 : vector<2x128xf32>
    %303 = arith.mulf %297, %302 : vector<2x128xf32>
    %c2_69 = arith.constant 2 : index
    %304 = memref.load %arg3[%c2_69] : memref<4xf32, #tpu.memory_space<smem>>
    %305 = vector.broadcast %304 : f32 to vector<2x128xf32>
    %306 = arith.addf %63, %305 : vector<2x128xf32>
    %c2_70 = arith.constant 2 : index
    %307 = memref.load %arg4[%c2_70] : memref<4xf32, #tpu.memory_space<smem>>
    %308 = vector.broadcast %307 : f32 to vector<2x128xf32>
    %309 = arith.addf %275, %308 : vector<2x128xf32>
    %310 = arith.negf %306 : vector<2x128xf32>
    %311 = math.exp %310 : vector<2x128xf32>
    %cst_71 = arith.constant 1.000000e+00 : f32
    %312 = vector.broadcast %cst_71 : f32 to vector<2x128xf32>
    %313 = arith.addf %312, %311 : vector<2x128xf32>
    %314 = arith.divf %312, %313 : vector<2x128xf32>
    %315 = arith.mulf %309, %314 : vector<2x128xf32>
    %c3_72 = arith.constant 3 : index
    %316 = memref.load %arg3[%c3_72] : memref<4xf32, #tpu.memory_space<smem>>
    %317 = vector.broadcast %316 : f32 to vector<2x128xf32>
    %318 = arith.addf %67, %317 : vector<2x128xf32>
    %c3_73 = arith.constant 3 : index
    %319 = memref.load %arg4[%c3_73] : memref<4xf32, #tpu.memory_space<smem>>
    %320 = vector.broadcast %319 : f32 to vector<2x128xf32>
    %321 = arith.addf %279, %320 : vector<2x128xf32>
    %322 = arith.negf %318 : vector<2x128xf32>
    %323 = math.exp %322 : vector<2x128xf32>
    %cst_74 = arith.constant 1.000000e+00 : f32
    %324 = vector.broadcast %cst_74 : f32 to vector<2x128xf32>
    %325 = arith.addf %324, %323 : vector<2x128xf32>
    %326 = arith.divf %324, %325 : vector<2x128xf32>
    %327 = arith.mulf %321, %326 : vector<2x128xf32>
    %c0_75 = arith.constant 0 : index
    %328 = memref.load %arg5[%c0_75] : memref<16xf32, #tpu.memory_space<smem>>
    %329 = vector.broadcast %328 : f32 to vector<2x128xf32>
    %330 = arith.mulf %291, %329 : vector<2x128xf32>
    %c1_76 = arith.constant 1 : index
    %331 = memref.load %arg5[%c1_76] : memref<16xf32, #tpu.memory_space<smem>>
    %332 = vector.broadcast %331 : f32 to vector<2x128xf32>
    %333 = arith.mulf %303, %332 : vector<2x128xf32>
    %334 = arith.addf %330, %333 : vector<2x128xf32>
    %c2_77 = arith.constant 2 : index
    %335 = memref.load %arg5[%c2_77] : memref<16xf32, #tpu.memory_space<smem>>
    %336 = vector.broadcast %335 : f32 to vector<2x128xf32>
    %337 = arith.mulf %315, %336 : vector<2x128xf32>
    %338 = arith.addf %334, %337 : vector<2x128xf32>
    %c3_78 = arith.constant 3 : index
    %339 = memref.load %arg5[%c3_78] : memref<16xf32, #tpu.memory_space<smem>>
    %340 = vector.broadcast %339 : f32 to vector<2x128xf32>
    %341 = arith.mulf %327, %340 : vector<2x128xf32>
    %342 = arith.addf %338, %341 : vector<2x128xf32>
    %c0_79 = arith.constant 0 : index
    %343 = memref.load %arg6[%c0_79] : memref<4xf32, #tpu.memory_space<smem>>
    %344 = vector.broadcast %343 : f32 to vector<2x128xf32>
    %345 = arith.addf %342, %344 : vector<2x128xf32>
    %c0_80 = arith.constant 0 : index
    %c0_81 = arith.constant 0 : index
    %c0_82 = arith.constant 0 : index
    %c0_83 = arith.constant 0 : index
    %346 = vector.load %arg11[%c0_80, %c0_81, %c0_82, %c0_83] : memref<1x4x2x128xf32, #tpu.memory_space<vmem>>, vector<1x1x2x128xf32>
    %347 = vector.shape_cast %346 : vector<1x1x2x128xf32> to vector<2x128xf32>
    %348 = vector.shape_cast %345 : vector<2x128xf32> to vector<1x1x2x128xf32>
    tpu.vector_store %arg11[%c0_80, %c0_81, %c0_82, %c0_83], %348 {strides = array<i32>} : memref<1x4x2x128xf32, #tpu.memory_space<vmem>>, vector<1x1x2x128xf32>,
    %c4_84 = arith.constant 4 : index
    %349 = memref.load %arg5[%c4_84] : memref<16xf32, #tpu.memory_space<smem>>
    %350 = vector.broadcast %349 : f32 to vector<2x128xf32>
    %351 = arith.mulf %291, %350 : vector<2x128xf32>
    %c5_85 = arith.constant 5 : index
    %352 = memref.load %arg5[%c5_85] : memref<16xf32, #tpu.memory_space<smem>>
    %353 = vector.broadcast %352 : f32 to vector<2x128xf32>
    %354 = arith.mulf %303, %353 : vector<2x128xf32>
    %355 = arith.addf %351, %354 : vector<2x128xf32>
    %c6_86 = arith.constant 6 : index
    %356 = memref.load %arg5[%c6_86] : memref<16xf32, #tpu.memory_space<smem>>
    %357 = vector.broadcast %356 : f32 to vector<2x128xf32>
    %358 = arith.mulf %315, %357 : vector<2x128xf32>
    %359 = arith.addf %355, %358 : vector<2x128xf32>
    %c7_87 = arith.constant 7 : index
    %360 = memref.load %arg5[%c7_87] : memref<16xf32, #tpu.memory_space<smem>>
    %361 = vector.broadcast %360 : f32 to vector<2x128xf32>
    %362 = arith.mulf %327, %361 : vector<2x128xf32>
    %363 = arith.addf %359, %362 : vector<2x128xf32>
    %c1_88 = arith.constant 1 : index
    %364 = memref.load %arg6[%c1_88] : memref<4xf32, #tpu.memory_space<smem>>
    %365 = vector.broadcast %364 : f32 to vector<2x128xf32>
    %366 = arith.addf %363, %365 : vector<2x128xf32>
    %c0_89 = arith.constant 0 : index
    %c1_90 = arith.constant 1 : index
    %c0_91 = arith.constant 0 : index
    %c0_92 = arith.constant 0 : index
    %367 = vector.load %arg11[%c0_89, %c1_90, %c0_91, %c0_92] : memref<1x4x2x128xf32, #tpu.memory_space<vmem>>, vector<1x1x2x128xf32>
    %368 = vector.shape_cast %367 : vector<1x1x2x128xf32> to vector<2x128xf32>
    %369 = vector.shape_cast %366 : vector<2x128xf32> to vector<1x1x2x128xf32>
    tpu.vector_store %arg11[%c0_89, %c1_90, %c0_91, %c0_92], %369 {strides = array<i32>} : memref<1x4x2x128xf32, #tpu.memory_space<vmem>>, vector<1x1x2x128xf32>,
    %c8_93 = arith.constant 8 : index
    %370 = memref.load %arg5[%c8_93] : memref<16xf32, #tpu.memory_space<smem>>
    %371 = vector.broadcast %370 : f32 to vector<2x128xf32>
    %372 = arith.mulf %291, %371 : vector<2x128xf32>
    %c9_94 = arith.constant 9 : index
    %373 = memref.load %arg5[%c9_94] : memref<16xf32, #tpu.memory_space<smem>>
    %374 = vector.broadcast %373 : f32 to vector<2x128xf32>
    %375 = arith.mulf %303, %374 : vector<2x128xf32>
    %376 = arith.addf %372, %375 : vector<2x128xf32>
    %c10_95 = arith.constant 10 : index
    %377 = memref.load %arg5[%c10_95] : memref<16xf32, #tpu.memory_space<smem>>
    %378 = vector.broadcast %377 : f32 to vector<2x128xf32>
    %379 = arith.mulf %315, %378 : vector<2x128xf32>
    %380 = arith.addf %376, %379 : vector<2x128xf32>
    %c11_96 = arith.constant 11 : index
    %381 = memref.load %arg5[%c11_96] : memref<16xf32, #tpu.memory_space<smem>>
    %382 = vector.broadcast %381 : f32 to vector<2x128xf32>
    %383 = arith.mulf %327, %382 : vector<2x128xf32>
    %384 = arith.addf %380, %383 : vector<2x128xf32>
    %c2_97 = arith.constant 2 : index
    %385 = memref.load %arg6[%c2_97] : memref<4xf32, #tpu.memory_space<smem>>
    %386 = vector.broadcast %385 : f32 to vector<2x128xf32>
    %387 = arith.addf %384, %386 : vector<2x128xf32>
    %c0_98 = arith.constant 0 : index
    %c2_99 = arith.constant 2 : index
    %c0_100 = arith.constant 0 : index
    %c0_101 = arith.constant 0 : index
    %388 = vector.load %arg11[%c0_98, %c2_99, %c0_100, %c0_101] : memref<1x4x2x128xf32, #tpu.memory_space<vmem>>, vector<1x1x2x128xf32>
    %389 = vector.shape_cast %388 : vector<1x1x2x128xf32> to vector<2x128xf32>
    %390 = vector.shape_cast %387 : vector<2x128xf32> to vector<1x1x2x128xf32>
    tpu.vector_store %arg11[%c0_98, %c2_99, %c0_100, %c0_101], %390 {strides = array<i32>} : memref<1x4x2x128xf32, #tpu.memory_space<vmem>>, vector<1x1x2x128xf32>,
    %c12_102 = arith.constant 12 : index
    %391 = memref.load %arg5[%c12_102] : memref<16xf32, #tpu.memory_space<smem>>
    %392 = vector.broadcast %391 : f32 to vector<2x128xf32>
    %393 = arith.mulf %291, %392 : vector<2x128xf32>
    %c13_103 = arith.constant 13 : index
    %394 = memref.load %arg5[%c13_103] : memref<16xf32, #tpu.memory_space<smem>>
    %395 = vector.broadcast %394 : f32 to vector<2x128xf32>
    %396 = arith.mulf %303, %395 : vector<2x128xf32>
    %397 = arith.addf %393, %396 : vector<2x128xf32>
    %c14_104 = arith.constant 14 : index
    %398 = memref.load %arg5[%c14_104] : memref<16xf32, #tpu.memory_space<smem>>
    %399 = vector.broadcast %398 : f32 to vector<2x128xf32>
    %400 = arith.mulf %315, %399 : vector<2x128xf32>
    %401 = arith.addf %397, %400 : vector<2x128xf32>
    %c15_105 = arith.constant 15 : index
    %402 = memref.load %arg5[%c15_105] : memref<16xf32, #tpu.memory_space<smem>>
    %403 = vector.broadcast %402 : f32 to vector<2x128xf32>
    %404 = arith.mulf %327, %403 : vector<2x128xf32>
    %405 = arith.addf %401, %404 : vector<2x128xf32>
    %c3_106 = arith.constant 3 : index
    %406 = memref.load %arg6[%c3_106] : memref<4xf32, #tpu.memory_space<smem>>
    %407 = vector.broadcast %406 : f32 to vector<2x128xf32>
    %408 = arith.addf %405, %407 : vector<2x128xf32>
    %c0_107 = arith.constant 0 : index
    %c3_108 = arith.constant 3 : index
    %c0_109 = arith.constant 0 : index
    %c0_110 = arith.constant 0 : index
    %409 = vector.load %arg11[%c0_107, %c3_108, %c0_109, %c0_110] : memref<1x4x2x128xf32, #tpu.memory_space<vmem>>, vector<1x1x2x128xf32>
    %410 = vector.shape_cast %409 : vector<1x1x2x128xf32> to vector<2x128xf32>
    %411 = vector.shape_cast %408 : vector<2x128xf32> to vector<1x1x2x128xf32>
    tpu.vector_store %arg11[%c0_107, %c3_108, %c0_109, %c0_110], %411 {strides = array<i32>} : memref<1x4x2x128xf32, #tpu.memory_space<vmem>>, vector<1x1x2x128xf32>,
    return
  }
  func.func @transform_0(%arg0: i32, %arg1: i32) -> i32 {
    %c0_i32 = arith.constant 0 : i32
    %c0_i32_0 = arith.constant 0 : i32
    return %c0_i32 : i32
  }
  func.func @transform_1(%arg0: i32, %arg1: i32) -> i32 {
    %c0_i32 = arith.constant 0 : i32
    %c0_i32_0 = arith.constant 0 : i32
    return %c0_i32 : i32
  }
  func.func @transform_2(%arg0: i32, %arg1: i32) -> i32 {
    %c0_i32 = arith.constant 0 : i32
    %c0_i32_0 = arith.constant 0 : i32
    return %c0_i32 : i32
  }
  func.func @transform_3(%arg0: i32, %arg1: i32) -> i32 {
    %c0_i32 = arith.constant 0 : i32
    %c0_i32_0 = arith.constant 0 : i32
    return %c0_i32 : i32
  }
  func.func @transform_4(%arg0: i32, %arg1: i32) -> i32 {
    %c0_i32 = arith.constant 0 : i32
    %c0_i32_0 = arith.constant 0 : i32
    return %c0_i32 : i32
  }
  func.func @transform_5(%arg0: i32, %arg1: i32) -> (i32, i32, i32, i32) {
    %c0_i32 = arith.constant 0 : i32
    %c0_i32_0 = arith.constant 0 : i32
    %c0_i32_1 = arith.constant 0 : i32
    return %arg0, %c0_i32, %arg1, %c0_i32_0 : i32, i32, i32, i32
  }
  func.func @transform_6(%arg0: i32, %arg1: i32) -> (i32, i32, i32, i32) {
    %c0_i32 = arith.constant 0 : i32
    %c0_i32_0 = arith.constant 0 : i32
    %c0_i32_1 = arith.constant 0 : i32
    return %arg0, %c0_i32, %arg1, %c0_i32_0 : i32, i32, i32, i32
  }
  func.func @transform_7(%arg0: i32, %arg1: i32) -> (i32, i32, i32, i32) {
    %c0_i32 = arith.constant 0 : i32
    %c0_i32_0 = arith.constant 0 : i32
    %c0_i32_1 = arith.constant 0 : i32
    return %arg0, %c0_i32, %arg1, %c0_i32_0 : i32, i32, i32, i32
  }
  func.func @transform_8(%arg0: i32, %arg1: i32) -> (i32, i32, i32, i32) {
    %c0_i32 = arith.constant 0 : i32
    %c0_i32_0 = arith.constant 0 : i32
    %c0_i32_1 = arith.constant 0 : i32
    return %arg0, %c0_i32, %arg1, %c0_i32_0 : i32, i32, i32, i32
  }
  func.func @transform_9(%arg0: i32, %arg1: i32) -> (i32, i32, i32, i32) {
    %c0_i32 = arith.constant 0 : i32
    %c0_i32_0 = arith.constant 0 : i32
    %c0_i32_1 = arith.constant 0 : i32
    return %arg0, %c0_i32, %arg1, %c0_i32_0 : i32, i32, i32, i32
  }
}

</mosaic_0001>

<bundles_post_ra>
// kernel: tpu_custom_call.1
= control target key start
LH: loop header
LB: loop body
LE: loop exit
PB: predicated region body
PF: predicated region fallthrough
CT: control target
= control target key end

     0   :  { %s2477_s0 = inlined_call_operand.hbm [shape: f32[64], index: 0, kind: input, shape index: {}]   ;;  %s2478_s1 = inlined_call_operand.vmem [shape: f32[4], index: 1, kind: input, shape index: {}]   ;;  %s2479_s2 = inlined_call_operand.vmem [shape: f32[4], index: 2, kind: input, shape index: {}]   ;;  %s2480_s3 = inlined_call_operand.hbm [shape: f32[16], index: 3, kind: input, shape index: {}]   ;;  %s2481_s4 = inlined_call_operand.hbm [shape: f32[4], index: 4, kind: input, shape index: {}]   ;;  %s2482_s5 = inlined_call_operand.vmem [shape: f32[2,4,2,128], index: 5, kind: input, shape index: {}]   ;;  %s2483_s6 = inlined_call_operand.hbm [shape: f32[2,4,2,128], index: 6, kind: input, shape index: {}]   ;;  %s2484_s7 = inlined_call_operand.hbm [shape: f32[2,4,2,128], index: 7, kind: input, shape index: {}]   ;;  %s2485_s8 = inlined_call_operand.hbm [shape: f32[2,4,2,128], index: 8, kind: input, shape index: {}]   ;;  %s2486_s9 = inlined_call_operand.hbm [shape: f32[2,4,2,128], index: 9, kind: output, shape index: {}]  }
   0x1   :  { %2508 = sst [smem:[#allocation34_spill]] %s2477_s0 }
   0x2   :  { %2509 = sst [smem:[#allocation35_spill]] %s2478_s1 }
   0x3   :  { %2510 = sst [smem:[#allocation36_spill]] %s2479_s2 }
   0x4   :  { %2511 = sst [smem:[#allocation37_spill]] %s2480_s3 }
   0x5   :  { %2512 = sst [smem:[#allocation38_spill]] %s2482_s5 }
   0x6   :  { %2513 = sst [smem:[#allocation39_spill]] %s2484_s7 }
   0x7   :  { %2514 = sst [smem:[#allocation40_spill]] %s2486_s9 }
   0x8   :  { %14 = vsyncpa [#allocation5], 0 }
   0x9   :  { %15 = vsyncpa [#allocation6], 0 }
   0xa   :  { %16 = vsyncpa [#allocation9], 0 }
   0xb   :  { %17 = vsyncpa [#allocation11], 0 }
   0xc   :  { %18 = vsyncpa [#allocation3], 0 }
   0xd   :  { %20 = vsyncpa [#allocation3 + $0x1], 0 }
   0xe   :  { %21 = vsyncpa [#allocation15], 0 }
   0xf   :  { %23 = vsyncpa [#allocation15 + $0x1], 0 }
  0x10   :  { %24 = vsyncpa [#allocation4], 0 }
  0x11   :  { %26 = vsyncpa [#allocation4 + $0x1], 0  ;;  %s1781_s30 = smov 0   ;;  %s1783_s10 = smov 0  }
  0x12   :  { %s1785_s11 = smov 0   ;;  %s1787_s12 = smov 0  }
  0x13   :  { %s1789_s13 = smov 0   ;;  %s1791_s14 = smov 0  }
  0x14 LB: > { %2515 = sst [smem:[#allocation25_spill]] %s1696_s30  ;;  %s1812_s15 = sadd.s32 4294967295, %s1716_s14   ;;  %s1716_s14 = sphi %s1791_s14, %s32_s14   ;;  %s1712_s13 = sphi %s1789_s13, %s2563_s13   ;;  %s1708_s12 = sphi %s1787_s12, %s2562_s12   ;;  %s1704_s11 = sphi %s1785_s11, %s2566_s11   ;;  %s1700_s10 = sphi %s1783_s10, %s2565_s10   ;;  %s1696_s30 = sphi %s1781_s30, %s2564_s30  }
  0x15   : > { %2516 = sst [smem:[#allocation26_spill]] %s1708_s12  ;;  %p1168_p0 = scmp.ge.s32.totalorder %s1716_s14, 1 }
  0x16   : > { %2517 = sst [smem:[#allocation27_spill]] %s1712_s13  ;;  %p2496_p1 = scmp.eq.s32.totalorder %s1812_s15, 0 }
  0x17   : > { %2518 = sst [smem:[#allocation28_spill]] %s1716_s14  ;;  %p281_p2 = scmp.eq.s32.totalorder %s1812_s15, 1 }
  0x18   : > { %p294_p3 = scmp.lt.s32.totalorder %s1716_s14, 3  ;;  %s1167_s18 = sadd.s32 4294967294, %s1716_s14  }
  0x19   : > { %s44_s19 = sadd.s32 1, %s1712_s13  ;;  %s186_s20 = sadd.s32 1, %s1704_s11 }
  0x1a   : > { %p1819_p5 = pnand %p1168_p0, %p294_p3  ;;  %p46_p8 = scmp.ge.s32.totalorder %s44_s19, 2 }
  0x1b   : > { %s2521_s3 = sld [smem:[#allocation37_spill]] }
  0x1c   : > { %s2519_s16 = scalar_select %p1819_p5, 1, 0 }
  0x1d   : > { %p1340_p6 = pneg %p1819_p5 }
  0x1f   : > { %p1827_p7 = pnand %p1340_p6, %p2496_p1 }
  0x21   : > { %s2520_s17 = scalar_select %p1827_p7, 1, 0 }
  0x22   : > { %s1455_s23 = scalar_lea.hbm %s2521_s3, 16  ;;  %p1842_p10 = pneg %p1827_p7 }
  0x23   : > { %p1456_p9 = scmp.ne.s32.totalorder %s2521_s3, %s1455_s23  ;;  %p1462_p13 = scmp.lt.u32.totalorder %s1455_s23, %s2521_s3 }
  0x24   : > { %s2522_s26 = scalar_select %p1842_p10, 1, 0 }
  0x25   : > { %p1458_p11 = pnand %p1842_p10, %p1456_p9 }
  0x27   : > { %p1459_p12 = pneg %p1458_p11 }
  0x29   : > { %p1464_p0 = pnand %p1462_p13, %p1459_p12 }
  0x2b   : > { %1467 = shalt.err (!%p1464_p0)
}
  0x2c   : > { %s1718_s29 = smov [#allocation10]   ;;  %s2568_s19 = smov (%p46_p8, %s44_s19), 0 }
  0x2d   : > { %1352 = dma.hbm_to_smem (!%p1827_p7), %s2521_s3, 16, %s1718_s29, [#allocation11]  }
  0x2e   : > { %2523 = sst [smem:[#allocation29_spill]] %s2568_s19  ;;  %p193_p3 = scmp.ne.s32.totalorder %s1704_s11, %s1700_s10 }
  0x2f   : > { %p194_p6 = scmp.eq.s32.totalorder %s1716_s14, 0  ;;  %s181_s23 = ssub.s32 %s1712_s13, %s2568_s19 }
  0x30   : > { %p199_p9 = scmp.ne.s32.totalorder %s1700_s10, %s1696_s30  ;;  %p184_p11 = scmp.eq.s32.totalorder %s181_s23, 0 }
  0x31   : > { %p195_p12 = por %p194_p6, %p193_p3  ;;  %p1873_p0 = por %p281_p2, %p193_p3 }
  0x32   : > { %p1867_p13 = por %p2496_p1, %p199_p9  ;;  %p287_p8 = scmp.eq.s32.totalorder %s1167_s18, 1 }
  0x33   : > { %s2526_s25 = scalar_select %p1873_p0, 1, 0 }
  0x34   : > { %s2524_s24 = scalar_select %p1867_p13, 1, 0 }
  0x35   : > { %2527 = sst [smem:[#allocation31_spill]] %s2526_s25  ;;  %p1375_p4 = scmp.lt.s32.totalorder %s1716_s14, 2 }
  0x36   : > { %2525 = sst [smem:[#allocation30_spill]] %s2524_s24  ;;  %s2490_s28 = sand.u32 1, %s1704_s11  }
  0x37   : > { %s1878_s27 = scalar_select %p184_p11, %s1704_s11, %s186_s20  }
  0x38   : > { %s1883_s29 = sshll.u32 %s1712_s13, 7  ;;  %p1885_p5 = por %p287_p8, %p199_p9 }
  0x39   : > { %2528 = sst [smem:[#allocation32_spill]] %s1878_s27  ;;  %s1891_s22 = sshll.u32 %s2490_s28, 3 }
  0x3a   : > { %s2529_s21 = scalar_select %p1885_p5, 1, 0 }
  0x3b   : > { %p1893_p2 = pnand %p1375_p4, %p195_p12  ;;  %s389_s20 = sand.u32 1, %s1716_s14  }
  0x3c   : > { %2530 = sst [smem:[#allocation33_spill]] %s2529_s21  ;;  %s2532_s7 = sld [smem:[#allocation39_spill]] }
  0x3d   : > { %s393_s13 = scalar_lea.vmem [#allocation14], %s1891_s22  ;;  %s1907_s28 = scalar_lea.sflag [#allocation15], %s389_s20 }
  0x3e   : > { %s401_s27 = sshll.u32 %s393_s13, 4  ;;  %p1913_p3 = pneg %p1893_p2  ;;  %s1905_s27 = int_to_ptr.vmem [resolvable:$true] %s401_s27 }
  0x42   : > { %s1902_s19 = scalar_lea.hbm %s2532_s7, %s1883_s29  ;;  %s1473_s30 = scalar_lea.hbm %s2532_s7, 256 }
  0x43   : > { %s1468_s21 = scalar_lea.hbm %s1902_s19, 128  ;;  %p1474_p11 = scmp.lt.u32.totalorder %s1902_s19, %s2532_s7 }
  0x44   : > { %p1469_p4 = scmp.ne.s32.totalorder %s1902_s19, %s1468_s21  ;;  %p1475_p12 = scmp.lt.u32.totalorder %s1473_s30, %s1468_s21 }
  0x45   : > { %p1477_p1 = scmp.lt.u32.totalorder %s1468_s21, %s1902_s19 }
  0x46   : > { %p1471_p6 = pnand %p1913_p3, %p1469_p4  ;;  %p1476_p8 = por %p1475_p12, %p1474_p11 }
  0x48   : > { %p1472_p9 = pneg %p1471_p6  ;;  %p1478_p5 = por %p1477_p1, %p1476_p8 }
  0x4a   : > { %p1479_p0 = pnand %p1478_p5, %p1472_p9 }
  0x4c   : > { %1482 = shalt.err (!%p1479_p0)
}
  0x4d   : > { %s1483_s20 = scalar_lea.vmem %s1905_s27, 128  ;;  %s1719_s3 = smov [#allocation14]  }
  0x4e   : > { %p1484_p4 = scmp.ne.s32.totalorder %s1905_s27, %s1483_s20  ;;  %s1488_s18 = sshll.u32 %s1719_s3, 4  ;;  %s1489_s18 = int_to_ptr.vmem [resolvable:$false] %s1488_s18 }
  0x4f   : > { %s1490_s9 = scalar_lea.vmem %s1489_s18, 256  ;;  %p1491_p7 = scmp.lt.s32.totalorder %s1905_s27, %s1489_s18 }
  0x50   : > { %p1486_p6 = pnand %p1484_p4, %p1913_p3  ;;  %p1492_p10 = scmp.lt.s32.totalorder %s1490_s9, %s1483_s20 }
  0x52   : > { %p1487_p13 = pneg %p1486_p6  ;;  %p1493_p11 = por %p1492_p10, %p1491_p7 }
  0x54   : > { %p1494_p12 = pnand %p1493_p11, %p1487_p13 }
  0x56   : > { %1497 = shalt.err (!%p1494_p12)
}
  0x57   : > { %s1720_s30 = smov 32   ;;  %s1721_s21 = smov 2  }
  0x58   : > { %1362 = dma.hbm_to_vmem [thread:$0]  (!%p1893_p2), %s1902_s19, 128, %s1905_s27, %s1907_s28, %s1720_s30, %s1720_s30, %s1721_s21  }
  0x59   : > { %s2534_s1 = sld [smem:[#allocation35_spill]]  ;;  %s2535_s0 = sld [smem:[#allocation34_spill]] }
  0x5a   : > { %p2536_p5 = scmp.ne.s32.totalorder %s2522_s26, 0 }
  0x5f   : > { %s316_s18 = sshll.u32 %s2534_s1, 4  ;;  %s1498_s7 = scalar_lea.hbm %s2535_s0, 16  ;;  %s317_s18 = int_to_ptr.vmem [resolvable:$true] %s316_s18 }
  0x60   : > { %p1499_p1 = scmp.ne.s32.totalorder %s2535_s0, %s1498_s7  ;;  %p1505_p13 = scmp.lt.u32.totalorder %s1498_s7, %s2535_s0 }
  0x62   : > { %p1501_p7 = pnand %p1499_p1, %p2536_p5 }
  0x64   : > { %p1502_p10 = pneg %p1501_p7 }
  0x66   : > { %p1507_p0 = pnand %p1505_p13, %p1502_p10 }
  0x68   : > { %1510 = shalt.err (!%p1507_p0)
}
  0x69   : > { %s1722_s19 = smov [#allocation2]   ;;  %p2537_p9 = scmp.ne.s32.totalorder %s2520_s17, 0 }
  0x6a   : > { %s1511_s5 = scalar_lea.vmem %s317_s18, 16  ;;  %p1519_p11 = scmp.lt.s32.totalorder %s317_s18, %s317_s18 }
  0x6b   : > { %1343 = dma.hbm_to_smem (!%p2537_p9), %s2535_s0, 16, %s1722_s19, [#allocation5]  }
  0x6c   : > { %p1512_p8 = scmp.ne.s32.totalorder %s317_s18, %s1511_s5  ;;  %p1520_p12 = scmp.lt.s32.totalorder %s1511_s5, %s1511_s5 }
  0x6e   : > { %p1514_p4 = pnand %p1512_p8, %p2536_p5  ;;  %p1521_p1 = por %p1520_p12, %p1519_p11 }
  0x70   : > { %p1515_p6 = pneg %p1514_p4 }
  0x72   : > { %p1522_p7 = pnand %p1521_p1, %p1515_p6 }
  0x74   : > { %1525 = shalt.err (!%p1522_p7)
}
  0x75   : > { %s1723_s7 = smov [#allocation7]   ;;  %s2538_s2 = sld [smem:[#allocation36_spill]] }
  0x76   : > { %1346 = dma.vmem_to_smem (!%p2537_p9), %s317_s18, 16, %s1723_s7, [#allocation6]  }
  0x7b   : > { %s327_s25 = sshll.u32 %s2538_s2, 4  ;;  %s328_s25 = int_to_ptr.vmem [resolvable:$true] %s327_s25 }
  0x7c   : > { %s1526_s3 = scalar_lea.vmem %s328_s25, 16  ;;  %p1534_p8 = scmp.lt.s32.totalorder %s328_s25, %s328_s25 }
  0x7d   : > { %p1527_p10 = scmp.ne.s32.totalorder %s328_s25, %s1526_s3  ;;  %p1535_p4 = scmp.lt.s32.totalorder %s1526_s3, %s1526_s3 }
  0x7f   : > { %p1529_p13 = pnand %p1527_p10, %p2536_p5  ;;  %p1536_p11 = por %p1535_p4, %p1534_p8 }
  0x81   : > { %p1530_p0 = pneg %p1529_p13 }
  0x83   : > { %p1537_p6 = pnand %p1536_p11, %p1530_p0 }
  0x85   : > { %1540 = shalt.err (!%p1537_p6)
}
  0x86   : > { %s1724_s20 = smov [#allocation8]   ;;  %s1541_s19 = scalar_lea.hbm %s2481_s4, 16 }
  0x87   : > { %1349 = dma.vmem_to_smem (!%p2537_p9), %s328_s25, 16, %s1724_s20, [#allocation9]  }
  0x88   : > { %p1542_p12 = scmp.ne.s32.totalorder %s2481_s4, %s1541_s19  ;;  %p1548_p10 = scmp.lt.u32.totalorder %s1541_s19, %s2481_s4 }
  0x8a   : > { %p1544_p1 = pnand %p1542_p12, %p2536_p5 }
  0x8c   : > { %p1545_p7 = pneg %p1544_p1 }
  0x8e   : > { %p1550_p13 = pnand %p1548_p10, %p1545_p7 }
  0x90   : > { %1553 = shalt.err (!%p1550_p13)
}
  0x91   : > { %s1725_s12 = smov [#allocation12]   ;;  %s1990_s20 = scalar_lea.hbm %s2483_s6, %s1883_s29 }
  0x92   : > { %1355 = dma.hbm_to_smem (!%p2537_p9), %s2481_s4, 16, %s1725_s12, [#allocation11]  }
  0x93   : > { %s371_s18 = scalar_lea.vmem [#allocation13], %s1891_s22  ;;  %s2539_s17 = sand.u32 1, %s1704_s11  }
  0x94   : > { %s379_s9 = sshll.u32 %s371_s18, 4  ;;  %s1997_s19 = scalar_lea.sflag [#allocation3], %s2539_s17  ;;  %s1993_s9 = int_to_ptr.vmem [resolvable:$true] %s379_s9 }
  0x95   : > { %s1554_s27 = scalar_lea.hbm %s1990_s20, 128  ;;  %s1559_s7 = scalar_lea.hbm %s2483_s6, 256 }
  0x96   : > { %p1555_p5 = scmp.ne.s32.totalorder %s1990_s20, %s1554_s27  ;;  %p1560_p8 = scmp.lt.u32.totalorder %s1990_s20, %s2483_s6 }
  0x97   : > { %p1561_p4 = scmp.lt.u32.totalorder %s1559_s7, %s1554_s27  ;;  %p1563_p6 = scmp.lt.u32.totalorder %s1554_s27, %s1990_s20 }
  0x98   : > { %p1557_p9 = pnand %p1555_p5, %p1913_p3 }
  0x99   : > { %p1562_p11 = por %p1561_p4, %p1560_p8 }
  0x9a   : > { %p1558_p0 = pneg %p1557_p9 }
  0x9b   : > { %p1564_p12 = por %p1563_p6, %p1562_p11 }
  0x9d   : > { %p1565_p1 = pnand %p1564_p12, %p1558_p0 }
  0x9f   : > { %1568 = shalt.err (!%p1565_p1)
}
  0xa0   : > { %s1569_s25 = scalar_lea.vmem %s1993_s9, 128  ;;  %s1726_s26 = smov [#allocation13]  }
  0xa1   : > { %p1570_p7 = scmp.ne.s32.totalorder %s1993_s9, %s1569_s25  ;;  %s1574_s3 = sshll.u32 %s1726_s26, 4  ;;  %s1575_s3 = int_to_ptr.vmem [resolvable:$false] %s1574_s3 }
  0xa2   : > { %s1576_s18 = scalar_lea.vmem %s1575_s3, 256  ;;  %p1577_p5 = scmp.lt.s32.totalorder %s1993_s9, %s1575_s3 }
  0xa3   : > { %p1572_p10 = pnand %p1570_p7, %p1913_p3  ;;  %p1578_p9 = scmp.lt.s32.totalorder %s1576_s18, %s1569_s25 }
  0xa5   : > { %p1573_p13 = pneg %p1572_p10  ;;  %p1579_p8 = por %p1578_p9, %p1577_p5 }
  0xa7   : > { %p1580_p4 = pnand %p1579_p8, %p1573_p13 }
  0xa9   : > { %1583 = shalt.err (!%p1580_p4)
}
  0xaa   : > { %1359 = dma.hbm_to_vmem [thread:$0]  (!%p1893_p2), %s1990_s20, 128, %s1993_s9, %s1997_s19, %s1720_s30, %s1720_s30, %s1721_s21  }
  0xab   : > { %s2028_s13 = scalar_lea.hbm %s2485_s8, %s1883_s29  ;;  %s415_s5 = scalar_lea.vmem [#allocation16], %s1891_s22 }
  0xac   : > { %s423_s7 = sshll.u32 %s415_s5, 4  ;;  %s1584_s12 = scalar_lea.hbm %s2028_s13, 128  ;;  %s2031_s7 = int_to_ptr.vmem [resolvable:$true] %s423_s7 }
  0xad   : > { %p1585_p0 = scmp.ne.s32.totalorder %s2028_s13, %s1584_s12  ;;  %s1589_s9 = scalar_lea.hbm %s2485_s8, 256 }
  0xae   : > { %p1590_p12 = scmp.lt.u32.totalorder %s2028_s13, %s2485_s8  ;;  %p1591_p1 = scmp.lt.u32.totalorder %s1589_s9, %s1584_s12 }
  0xaf   : > { %p1587_p11 = pnand %p1585_p0, %p1913_p3  ;;  %p1593_p10 = scmp.lt.u32.totalorder %s1584_s12, %s2028_s13 }
  0xb0   : > { %p1592_p7 = por %p1591_p1, %p1590_p12 }
  0xb1   : > { %p1588_p6 = pneg %p1587_p11 }
  0xb2   : > { %p1594_p13 = por %p1593_p10, %p1592_p7 }
  0xb4   : > { %p1595_p5 = pnand %p1594_p13, %p1588_p6 }
  0xb6   : > { %1598 = shalt.err (!%p1595_p5)
}
  0xb7   : > { %s1599_s22 = scalar_lea.vmem %s2031_s7, 128  ;;  %s1727_s25 = smov [#allocation16]  }
  0xb8   : > { %p1600_p9 = scmp.ne.s32.totalorder %s2031_s7, %s1599_s22  ;;  %s1604_s26 = sshll.u32 %s1727_s25, 4  ;;  %s1605_s26 = int_to_ptr.vmem [resolvable:$false] %s1604_s26 }
  0xb9   : > { %s1606_s3 = scalar_lea.vmem %s1605_s26, 256  ;;  %p1607_p0 = scmp.lt.s32.totalorder %s2031_s7, %s1605_s26 }
  0xba   : > { %p1602_p8 = pnand %p1600_p9, %p1913_p3  ;;  %p1608_p11 = scmp.lt.s32.totalorder %s1606_s3, %s1599_s22 }
  0xbc   : > { %p1603_p4 = pneg %p1602_p8  ;;  %p1609_p12 = por %p1608_p11, %p1607_p0 }
  0xbe   : > { %p1610_p1 = pnand %p1609_p12, %p1603_p4 }
  0xc0   : > { %1613 = shalt.err (!%p1610_p1)
}
  0xc1   : > { %1365 = dma.hbm_to_vmem [thread:$0]  (!%p1893_p2), %s2028_s13, 128, %s2031_s7, %s1907_s28, %s1720_s30, %s1720_s30, %s1721_s21  }
  0xc2   : > { %p2540_p3 = scmp.ne.s32.totalorder %s2519_s16, 0 }
  0xc3   : > { %p2541_p6 = scmp.eq.s32.totalorder (!%p2540_p3), %s1812_s15, 0 }
  0xc4   : > { %435 = sbr.rel (%p2540_p3) target bundleno = 331 (0x14b), region = 56 }
  0xcb   : > { %1667 = dma.done.wait (%p2541_p6), [#allocation5], 16   ;;  %p2542_p7 = pmov %p2541_p6 }
  0xcc   : > { %p2543_p10 = pmov %p2541_p6 }
  0xcd   : > { %1669 = vsyncadd (%p2542_p7), [#allocation5], 4294967280 }
  0xce   : > { %1671 = dma.done.wait (%p2543_p10), [#allocation6], 16   ;;  %p2544_p13 = pmov %p2541_p6 }
  0xcf   : > { %p2545_p5 = pmov %p2541_p6 }
  0xd0   : > { %1673 = vsyncadd (%p2544_p13), [#allocation6], 4294967280 }
  0xd1   : > { %1675 = dma.done.wait (%p2545_p5), [#allocation9], 16   ;;  %p2546_p2 = pmov %p2545_p5 }
  0xd3   : > { %1677 = vsyncadd (%p2546_p2), [#allocation9], 4294967280  ;;  %p2547_p9 = pmov %p2546_p2 }
  0xd4   : > { %p2548_p8 = pmov %p2546_p2 }
  0xd5   : > { %1679 = dma.done.wait (%p2547_p9), [#allocation11], 32  }
  0xd6   : > { %1681 = vsyncadd (%p2548_p8), [#allocation11], 4294967264  ;;  %s2549_s14 = sld [smem:[#allocation30_spill]]  ;;  %s2077_s16 = sand.u32 1, %s1700_s10  }
  0xd7   : > { %s2080_s28 = sshll.u32 %s2077_s16, 3  ;;  %s458_s23 = scalar_lea.sflag [#allocation3], %s2077_s16 }
  0xd8   : > { %s2084_s30 = scalar_lea.vmem [#allocation13], %s2080_s28 }
  0xdc   : > { %p2550_p4 = scmp.ne.s32.totalorder %s2549_s14, 0 }
  0xde   : > { %1683 = dma.done.wait (%p2550_p4), %s458_s23, 128  }
  0xdf   : > { %1685 = vsyncadd (%p2550_p4), %s458_s23, 4294967168  ;;  %s466_s21 = sand.u32 1, %s1812_s15   ;;  %s2092_s17 = scalar_lea.vmem [#allocation14], %s2080_s28 }
  0xe0   : > { %s467_s18 = scalar_lea.sflag [#allocation15], %s466_s21 }
  0xe1   : > { %1687 = dma.done.wait (%p2550_p4), %s467_s18, 256  }
  0xe2   : > { %1689 = vsyncadd (%p2550_p4), %s467_s18, 4294967040  ;;  %s2099_s27 = scalar_lea.vmem [#allocation16], %s2080_s28 }
  0xe3   : > { %484 = sfence }
  0xe4   : > { %s2551_s13 = sld [smem:[#allocation26_spill]]  ;;  %s542_s12 = sld [smem:[#allocation2]]  ;;  %v608_v12 = vld [vmem:[%s2084_s30] sm:$0x3]  ;;  %v1218_v13 = vld [vmem:[%s2084_s30 + $0x2] sm:$0x3] }
  0xe5   : > { %s1200_s24 = sld [smem:[#allocation2 + $0x1]]  ;;  %s1196_s15 = sld [smem:[#allocation2 + $0x4]]  ;;  %v1223_v32 = vld [vmem:[%s2084_s30 + $0x4] sm:$0x3]  ;;  %v1228_v50 = vld [vmem:[%s2084_s30 + $0x6] sm:$0x3] }
  0xe6   : > { %s1197_s20 = sld [smem:[#allocation2 + $0x8]]  ;;  %s2552_s29 = sld [smem:[#allocation38_spill]] }
  0xe7   : > { %s2108_s25 = sld [smem:[#allocation2 + $0xc]]  ;;  %s2110_s26 = sld [smem:[#allocation2 + $0x5]] }
  0xe8   : > { %s2112_s3 = sld [smem:[#allocation2 + $0x9]]  ;;  %s2114_s14 = sld [smem:[#allocation2 + $0x10]] }
  0xe9   : > { %s2116_s23 = sld [smem:[#allocation2 + $0x14]]  ;;  %s2118_s21 = sld [smem:[#allocation2 + $0x11]] }
  0xea   : > { %p533_p0 = scmp.lt.s32.totalorder %s2551_s13, 1  ;;  %s2120_s18 = sld [smem:[#allocation2 + $0x15]]  ;;  %v543_v1 = vstv %s542_s12 }
  0xeb   : > { %s2126_s9 = sld [smem:[#allocation2 + $0x1c]]  ;;  %s2128_s19 = sld [smem:[#allocation2 + $0x1d]]  ;;  %v557_v3 = vstv %s1200_s24  ;;  %v546_v4 = vstv %s1196_s15 }
  0xec   : > { %s534_s5 = scalar_select %p533_p0, %s2551_s13, 1  ;;  %v549_v5 = vstv %s1197_s20 }
  0xed   : > { %s2136_s0 = sld [smem:[#allocation2 + $0x16]]  ;;  %s2138_s1 = sld [smem:[#allocation2 + $0xd]]  ;;  %v552_v7 = vstv %s2108_s25  ;;  %v561_v9 = vstv %s2110_s26 }
  0xee   : > { %s1310_s7 = sshll.u32 %s534_s5, 3  ;;  %s2122_s5 = sld [smem:[#allocation2 + $0x18]]  ;;  %v610_v14 = vstv %s2114_s14  ;;  %v565_v23 = vstv %s2112_s3 }
  0xef   : > { %s2106_s22 = scalar_lea.vmem %s2552_s29, %s1310_s7  ;;  %s2124_s7 = sld [smem:[#allocation2 + $0x19]]  ;;  %v613_v15 = vstv %s2116_s23  ;;  %v624_v16 = vstv %s2118_s21  ;;  %v611_v26 = vmul.f32 %v610_v14, %v608_v12 }
  0xf0   : > { %v541_v0 = vld [vmem:[%s2106_s22] sm:$0x3]  ;;  %v2132_v2 = vld [vmem:[%s2106_s22 + $0x2] sm:$0x3]  ;;  %s2134_s29 = sld [smem:[#allocation2 + $0x12]]  ;;  %s2147_s24 = sld [smem:[#allocation2 + $0x1e]]  ;;  %v628_v17 = vstv %s2120_s18  ;;  %v614_v27 = vmul.f32 %v613_v15, %v608_v12  ;;  %v625_v28 = vmul.f32 %v1218_v13, %v624_v16 }
  0xf1   : > { %s2140_s2 = sld [smem:[#allocation2 + $0x1a]]  ;;  %v544_v6 = vmul.f32 %v543_v1, %v541_v0  ;;  %v558_v8 = vmul.f32 %v2132_v2, %v557_v3  ;;  %v547_v10 = vmul.f32 %v546_v4, %v541_v0  ;;  %v550_v11 = vmul.f32 %v549_v5, %v541_v0  ;;  %s2155_s15 = sld [smem:[#allocation2 + $0x13]]  ;;  %v2198_v43 = vld [vmem:[%s2106_s22 + $0x4] sm:$0x3]  ;;  %v675_v3 = vld [vmem:[%s2092_s17] sm:$0x3] }
  0xf2   : > { %s2145_s12 = sld [smem:[#allocation2 + $0x2]]  ;;  %s2157_s20 = sld [smem:[#allocation2 + $0x17]]  ;;  %v2159_v18 = vmul.f32 %v552_v7, %v541_v0  ;;  %v562_v19 = vmul.f32 %v2132_v2, %v561_v9  ;;  %v619_v24 = vstv %s2126_s9  ;;  %v636_v25 = vstv %s2128_s19 }
  0xf3   : > { %s2164_s25 = sld [smem:[#allocation2 + $0x1b]]  ;;  %v2166_v22 = vadd.f32 %v558_v8, %v544_v6  ;;  %s2169_s26 = sld [smem:[#allocation2 + $0x6]]  ;;  %v629_v29 = vmul.f32 %v1218_v13, %v628_v17  ;;  %v646_v34 = vstv %s2136_s0  ;;  %v566_v35 = vmul.f32 %v2132_v2, %v565_v23 }
  0xf4   : > { %v616_v20 = vstv %s2122_s5  ;;  %s2173_s14 = sld [smem:[#allocation2 + $0x1f]]  ;;  %s2178_s3 = sld [smem:[#allocation2 + $0x20]]  ;;  %v620_v36 = vmul.f32 %v619_v24, %v608_v12  ;;  %v637_v37 = vmul.f32 %v1218_v13, %v636_v25  ;;  %v2188_v39 = vadd.f32 %v562_v19, %v547_v10 }
  0xf5   : > { %v632_v21 = vstv %s2124_s7  ;;  %v617_v30 = vmul.f32 %v616_v20, %v608_v12  ;;  %s2180_s23 = sld [smem:[#allocation2 + $0x24]]  ;;  %s2183_s21 = sld [smem:[#allocation2 + $0xa]]  ;;  %v569_v40 = vstv %s2138_s1  ;;  %v626_v44 = vadd.f32 %v625_v28, %v611_v26 }
  0xf6   : > { %v633_v31 = vmul.f32 %v1218_v13, %v632_v21  ;;  %v642_v33 = vstv %s2134_s29  ;;  %s2186_s18 = sld [smem:[#allocation2 + $0x28]]  ;;  %s2192_s0 = sld [smem:[#allocation2 + $0xe]]  ;;  %v654_v42 = vstv %s2147_s24  ;;  %v630_v45 = vadd.f32 %v629_v29, %v614_v27  ;;  %v1237_v21 = vld [vmem:[%s2092_s17 + $0x2] sm:$0x3] }
  0xf7   : > { %v650_v38 = vstv %s2140_s2  ;;  %s2195_s5 = sld [smem:[#allocation2 + $0x2c]]  ;;  %v643_v46 = vmul.f32 %v1223_v32, %v642_v33  ;;  %v647_v47 = vmul.f32 %v1223_v32, %v646_v34  ;;  %v660_v51 = vstv %s2155_s15  ;;  %s2203_s1 = sld [smem:[#allocation2 + $0x21]] }
  0xf8   : > { %v575_v41 = vstv %s2145_s12  ;;  %v634_v48 = vadd.f32 %v633_v31, %v617_v30  ;;  %v651_v49 = vmul.f32 %v1223_v32, %v650_v38  ;;  %v664_v52 = vstv %s2157_s20  ;;  %s2207_s2 = sld [smem:[#allocation2 + $0x25]]  ;;  %s2209_s7 = sld [smem:[#allocation2 + $0x29]] }
  0xf9   : > { %v570_v53 = vmul.f32 %v2132_v2, %v569_v40  ;;  %v638_v54 = vadd.f32 %v637_v37, %v620_v36  ;;  %v655_v55 = vmul.f32 %v1223_v32, %v654_v42  ;;  %v668_v56 = vstv %s2164_s25  ;;  %s2216_s30 = sld [smem:[#allocation2 + $0x2d]]  ;;  %s2218_s9 = sld [smem:[#allocation2 + $0x3]] }
  0xfa   : > { %v2211_v57 = vadd.f32 %v566_v35, %v550_v11  ;;  %v576_v58 = vmul.f32 %v2198_v43, %v575_v41  ;;  %v579_v59 = vstv %s2169_s26  ;;  %v672_v60 = vstv %s2173_s14  ;;  %s2220_s19 = sld [smem:[#allocation2 + $0x7]]  ;;  %s2225_s29 = sld [smem:[#allocation2 + $0x22]]  ;;  %v1209_v35 = vld [vmem:[%s2106_s22 + $0x6] sm:$0x3] }
  0xfb   : > { %v644_v61 = vadd.f32 %v643_v46, %v626_v44  ;;  %v648_v62 = vadd.f32 %v647_v47, %v630_v45  ;;  %v661_v63 = vmul.f32 %v1228_v50, %v660_v51  ;;  %v665_v0 = vmul.f32 %v1228_v50, %v664_v52  ;;  %s2228_s12 = sld [smem:[#allocation2 + $0xb]]  ;;  %s2231_s24 = sld [smem:[#allocation2 + $0x26]] }
  0xfc   : > { %v652_v1 = vadd.f32 %v651_v49, %v634_v48  ;;  %v669_v2 = vmul.f32 %v1228_v50, %v668_v56  ;;  %v677_v4 = vstv %s2178_s3  ;;  %v681_v5 = vstv %s2180_s23  ;;  %s2239_s15 = sld [smem:[#allocation2 + $0x2a]]  ;;  %s2241_s20 = sld [smem:[#allocation2 + $0x2e]]  ;;  %v1247_v56 = vld [vmem:[%s2092_s17 + $0x6] sm:$0x3] }
  0xfd   : > { %v580_v6 = vmul.f32 %v2198_v43, %v579_v59  ;;  %v656_v7 = vadd.f32 %v655_v55, %v638_v54  ;;  %v673_v8 = vmul.f32 %v1228_v50, %v672_v60  ;;  %v685_v9 = vstv %s2186_s18  ;;  %s2243_s25 = sld [smem:[#allocation2 + $0xf]]  ;;  %s2250_s26 = sld [smem:[#allocation2 + $0x23]] }
  0xfe   : > { %v2234_v10 = vadd.f32 %v570_v53, %v2159_v18  ;;  %v583_v11 = vstv %s2183_s21  ;;  %v587_v12 = vstv %s2192_s0  ;;  %v689_v13 = vstv %s2195_s5  ;;  %s2254_s14 = sld [smem:[#allocation2 + $0x27]]  ;;  %s2262_s3 = sld [smem:[#allocation2 + $0x2b]] }
  0xff   : > { %v662_v14 = vadd.f32 %v661_v63, %v644_v61  ;;  %v666_v15 = vadd.f32 %v665_v0, %v648_v62  ;;  %v678_v16 = vmul.f32 %v677_v4, %v675_v3  ;;  %v682_v17 = vmul.f32 %v681_v5, %v675_v3  ;;  %s2264_s23 = sld [smem:[#allocation2 + $0x2f]]  ;;  %s2276_s21 = sld [smem:[#allocation2 + $0x30]] }
 0x100   : > { %v2246_v19 = vadd.f32 %v576_v58, %v2166_v22  ;;  %v670_v18 = vadd.f32 %v669_v2, %v652_v1  ;;  %v686_v20 = vmul.f32 %v685_v9, %v675_v3  ;;  %v695_v23 = vstv %s2203_s1  ;;  %s2279_s22 = sld [smem:[#allocation2 + $0x34]]  ;;  %s2281_s18 = sld [smem:[#allocation2 + $0x38]] }
 0x101   : > { %v674_v24 = vadd.f32 %v673_v8, %v656_v7  ;;  %v690_v25 = vmul.f32 %v689_v13, %v675_v3  ;;  %v699_v26 = vstv %s2207_s2  ;;  %v703_v27 = vstv %s2209_s7  ;;  %s2285_s0 = sld [smem:[#allocation7]]  ;;  %s2287_s5 = sld [smem:[#allocation7 + $0x1]] }
 0x102   : > { %v2257_v28 = vadd.f32 %v580_v6, %v2188_v39  ;;  %v584_v22 = vmul.f32 %v2198_v43, %v583_v11  ;;  %v588_v29 = vmul.f32 %v2198_v43, %v587_v12  ;;  %v707_v30 = vstv %s2216_s30  ;;  %v1242_v39 = vld [vmem:[%s2092_s17 + $0x4] sm:$0x3]  ;;  %s2290_s1 = sld [smem:[#allocation2 + $0x3c]]  ;;  %s2294_s2 = sld [smem:[#allocation7 + $0x2]] }
 0x103   : > { %v593_v31 = vstv %s2218_s9  ;;  %v679_v32 = vadd.f32 %v678_v16, %v662_v14  ;;  %v683_v33 = vadd.f32 %v682_v17, %v666_v15  ;;  %v696_v34 = vmul.f32 %v1237_v21, %v695_v23  ;;  %s2297_s17 = sld [smem:[#allocation2 + $0x31]]  ;;  %s2300_s7 = sld [smem:[#allocation2 + $0x35]]  ;;  %v746_v17 = vld [vmem:[%s2099_s27] sm:$0x3] }
 0x104   : > { %v687_v36 = vadd.f32 %v686_v20, %v670_v18  ;;  %v700_v37 = vmul.f32 %v1237_v21, %v699_v26  ;;  %v704_v38 = vmul.f32 %v1237_v21, %v703_v27  ;;  %v713_v40 = vstv %s2225_s29  ;;  %s2302_s30 = sld [smem:[#allocation7 + $0x3]]  ;;  %s2304_s9 = sld [smem:[#allocation2 + $0x39]] }
 0x105   : > { %v597_v41 = vstv %s2220_s19  ;;  %v691_v42 = vadd.f32 %v690_v25, %v674_v24  ;;  %v708_v43 = vmul.f32 %v1237_v21, %v707_v30  ;;  %v717_v44 = vstv %s2231_s24  ;;  %s2307_s19 = sld [smem:[#allocation2 + $0x3d]]  ;;  %s2316_s29 = sld [smem:[#allocation2 + $0x32]] }
 0x106   : > { %v585_v45 = vadd.f32 %v584_v22, %v2211_v57  ;;  %v601_v46 = vstv %s2228_s12  ;;  %v721_v47 = vstv %s2239_s15  ;;  %v725_v48 = vstv %s2241_s20  ;;  %s2318_s12 = sld [smem:[#allocation2 + $0x36]]  ;;  %s2320_s24 = sld [smem:[#allocation2 + $0x3a]] }
 0x107   : > { %v594_v49 = vmul.f32 %v1209_v35, %v593_v31  ;;  %v605_v50 = vstv %s2243_s25  ;;  %v697_v51 = vadd.f32 %v696_v34, %v679_v32  ;;  %v714_v52 = vmul.f32 %v1242_v39, %v713_v40  ;;  %s2322_s15 = sld [smem:[#allocation2 + $0x3e]]  ;;  %s2330_s20 = sld [smem:[#allocation2 + $0x33]] }
 0x108   : > { %v701_v53 = vadd.f32 %v700_v37, %v683_v33  ;;  %v705_v54 = vadd.f32 %v704_v38, %v687_v36  ;;  %v718_v55 = vmul.f32 %v1242_v39, %v717_v44  ;;  %v731_v57 = vstv %s2250_s26  ;;  %v1256_v37 = vld [vmem:[%s2099_s27 + $0x2] sm:$0x3]  ;;  %s2333_s25 = sld [smem:[#allocation2 + $0x37]]  ;;  %s2335_s26 = sld [smem:[#allocation2 + $0x3b]] }
 0x109   : > { %v709_v58 = vadd.f32 %v708_v43, %v691_v42  ;;  %v722_v59 = vmul.f32 %v1242_v39, %v721_v47  ;;  %v726_v60 = vmul.f32 %v1242_v39, %v725_v48  ;;  %v735_v61 = vstv %s2254_s14  ;;  %s2337_s14 = sld [smem:[#allocation2 + $0x3f]] }
 0x10a   : > { %v598_v62 = vmul.f32 %v1209_v35, %v597_v41  ;;  %v602_v63 = vmul.f32 %v1209_v35, %v601_v46  ;;  %v739_v0 = vstv %s2262_s3  ;;  %v743_v1 = vstv %s2264_s23  ;;  %s2346_s3 = sld [smem:[#allocation8]]  ;;  %s2348_s23 = sld [smem:[#allocation8 + $0x1]] }
 0x10b   : > { %v589_v2 = vadd.f32 %v588_v29, %v2234_v10  ;;  %v606_v3 = vmul.f32 %v1209_v35, %v605_v50  ;;  %v715_v4 = vadd.f32 %v714_v52, %v697_v51  ;;  %v732_v5 = vmul.f32 %v1247_v56, %v731_v57 }
 0x10c   : > { %v595_v6 = vadd.f32 %v594_v49, %v2246_v19  ;;  %v719_v7 = vadd.f32 %v718_v55, %v701_v53  ;;  %v736_v8 = vmul.f32 %v1247_v56, %v735_v61  ;;  %v723_v9 = vadd.f32 %v722_v59, %v705_v54  ;;  %v1261_v54 = vld [vmem:[%s2099_s27 + $0x4] sm:$0x3] }
 0x10d   : > { %v727_v10 = vadd.f32 %v726_v60, %v709_v58  ;;  %v740_v11 = vmul.f32 %v1247_v56, %v739_v0  ;;  %v744_v12 = vmul.f32 %v1247_v56, %v743_v1  ;;  %v599_v13 = vadd.f32 %v598_v62, %v2257_v28 }
 0x10e   : > { %v603_v14 = vadd.f32 %v602_v63, %v585_v45  ;;  %v607_v15 = vadd.f32 %v606_v3, %v589_v2  ;;  %v733_v16 = vadd.f32 %v732_v5, %v715_v4  ;;  %v748_v19 = vstv %s2276_s21  ;;  %v1266_v3 = vld [vmem:[%s2099_s27 + $0x6] sm:$0x3]  ;;  %s2351_s21 = sld [smem:[#allocation8 + $0x2]] }
 0x10f   : > { %v752_v18 = vstv %s2279_s22  ;;  %v737_v20 = vadd.f32 %v736_v8, %v719_v7  ;;  %v756_v21 = vstv %s2281_s18  ;;  %v818_v23 = vstv %s2285_s0  ;;  %s2353_s22 = sld [smem:[#allocation8 + $0x3]]  ;;  %s2357_s18 = sld [smem:[#allocation10]] }
 0x110   : > { %v831_v24 = vstv %s2287_s5  ;;  %v741_v25 = vadd.f32 %v740_v11, %v723_v9  ;;  %v745_v26 = vadd.f32 %v744_v12, %v727_v10  ;;  %v760_v27 = vstv %s2290_s1  ;;  %s2359_s0 = sld [smem:[#allocation10 + $0x1]]  ;;  %s2361_s27 = sld [smem:[#allocation10 + $0x2]] }
 0x111   : > { %v819_v28 = vadd.f32 %v818_v23, %v595_v6  ;;  %v749_v22 = vmul.f32 %v748_v19, %v746_v17  ;;  %v753_v29 = vmul.f32 %v752_v18, %v746_v17  ;;  %v832_v30 = vadd.f32 %v831_v24, %v599_v13  ;;  %s2363_s5 = sld [smem:[#allocation10 + $0x3]]  ;;  %s2365_s1 = sld [smem:[#allocation10 + $0x4]] }
 0x112   : > { %v844_v31 = vstv %s2294_s2  ;;  %v757_v32 = vmul.f32 %v756_v21, %v746_v17  ;;  %v766_v33 = vstv %s2297_s17  ;;  %v761_v36 = vmul.f32 %v760_v27, %v746_v17  ;;  %s2367_s2 = sld [smem:[#allocation10 + $0x5]]  ;;  %s2369_s17 = sld [smem:[#allocation10 + $0x6]] }
 0x113   : > { %v1271_v34 = vmul.f32 -1.442695, %v819_v28  ;;  %v845_v35 = vadd.f32 %v844_v31, %v603_v14  ;;  %v770_v38 = vstv %s2300_s7  ;;  %v1274_v39 = vmul.f32 -1.442695, %v832_v30  ;;  %s2371_s7 = sld [smem:[#allocation10 + $0x7]] }
 0x114   : > { %v857_v40 = vstv %s2302_s30  ;;  %v774_v41 = vstv %s2304_s9  ;;  %v750_v44 = vadd.f32 %v749_v22, %v733_v16  ;;  %v778_v45 = vstv %s2307_s19  ;;  %s2373_s30 = sld [smem:[#allocation10 + $0x8]]  ;;  %s2375_s9 = sld [smem:[#allocation10 + $0x9]] }
 0x115   : > { %1439 = vpow2.f32 %v1271_v34  ;;  %v1277_v42 = vmul.f32 -1.442695, %v845_v35  ;;  %v858_v43 = vadd.f32 %v857_v40, %v607_v15  ;;  %v754_v46 = vadd.f32 %v753_v29, %v737_v20  ;;  %s2377_s19 = sld [smem:[#allocation10 + $0xa]] }
 0x116   : > { %1441 = vpow2.f32 %v1274_v39  ;;  %v767_v47 = vmul.f32 %v1256_v37, %v766_v33  ;;  %v758_v49 = vadd.f32 %v757_v32, %v741_v25  ;;  %v762_v50 = vadd.f32 %v761_v36, %v745_v26 }
 0x117   : > { %1443 = vpow2.f32 %v1277_v42  ;;  %v1280_v48 = vmul.f32 -1.442695, %v858_v43  ;;  %v771_v51 = vmul.f32 %v1256_v37, %v770_v38  ;;  %v775_v52 = vmul.f32 %v1256_v37, %v774_v41 }
 0x118   : > { %v779_v53 = vmul.f32 %v1256_v37, %v778_v45  ;;  %v784_v55 = vstv %s2316_s29  ;;  %v788_v56 = vstv %s2318_s12  ;;  %v792_v57 = vstv %s2320_s24  ;;  %s2379_s29 = sld [smem:[#allocation10 + $0xb]]  ;;  %s2382_s12 = sld [smem:[#allocation10 + $0xc]] }
 0x119   : > { %1445 = vpow2.f32 %v1280_v48  ;;  %v796_v58 = vstv %s2322_s15  ;;  %v768_v59 = vadd.f32 %v767_v47, %v750_v44  ;;  %v772_v60 = vadd.f32 %v771_v51, %v754_v46  ;;  %s2384_s24 = sld [smem:[#allocation10 + $0xd]]  ;;  %s2387_s15 = sld [smem:[#allocation10 + $0xe]] }
 0x11a   : > { %v776_v61 = vadd.f32 %v775_v52, %v758_v49  ;;  %v785_v62 = vmul.f32 %v1261_v54, %v784_v55  ;;  %v789_v63 = vmul.f32 %v1261_v54, %v788_v56  ;;  %v780_v0 = vadd.f32 %v779_v53, %v762_v50 }
 0x11b   : > { %v793_v1 = vmul.f32 %v1261_v54, %v792_v57  ;;  %v797_v2 = vmul.f32 %v1261_v54, %v796_v58  ;;  %v802_v4 = vstv %s2330_s20  ;;  %v806_v5 = vstv %s2333_s25  ;;  %s2389_s20 = sld [smem:[#allocation10 + $0xf]]  ;;  %s2399_s25 = sld [smem:[#allocation12]] }
 0x11c   : > { %v810_v7 = vstv %s2335_s26  ;;  %v814_v8 = vstv %s2337_s14  ;;  %v786_v10 = vadd.f32 %v785_v62, %v768_v59  ;;  %v790_v11 = vadd.f32 %v789_v63, %v772_v60  ;;  %s2405_s26 = sld [smem:[#allocation12 + $0x1]]  ;;  %s2409_s14 = sld [smem:[#allocation12 + $0x2]] }
 0x11d   : > { %v803_v12 = vmul.f32 %v1266_v3, %v802_v4  ;;  %v794_v15 = vadd.f32 %v793_v1, %v776_v61  ;;  %v798_v16 = vadd.f32 %v797_v2, %v780_v0  ;;  %v807_v17 = vmul.f32 %v1266_v3, %v806_v5 }
 0x11e   : > { %v811_v18 = vmul.f32 %v1266_v3, %v810_v7  ;;  %v815_v20 = vmul.f32 %v1266_v3, %v814_v8  ;;  %v821_v27 = vstv %s2346_s3  ;;  %v834_v29 = vstv %s2348_s23  ;;  %s2415_s3 = sld [smem:[#allocation12 + $0x3]]  ;;  %s1311_s23 = sshll.u32 %s2551_s13, 7 }
 0x11f   : > { %v1440_v6 = vpop.eup %1439  ;;  %v804_v25 = vadd.f32 %v803_v12, %v786_v10  ;;  %v808_v26 = vadd.f32 %v807_v17, %v790_v11  ;;  %v847_v30 = vstv %s2351_s21  ;;  %v860_v31 = vstv %s2353_s22  ;;  %s532_s21 = scalar_lea.vmem [#allocation17], %s2080_s28  ;;  %s949_s28 = scalar_lea.sflag [#allocation4], %s2077_s16 }
 0x120   : > { %v1442_v9 = vpop.eup %1441  ;;  %v826_v13 = vadd.f32 1.0, %v1440_v6  ;;  %v812_v28 = vadd.f32 %v811_v18, %v794_v15  ;;  %v816_v22 = vadd.f32 %v815_v20, %v798_v16  ;;  %v870_v36 = vstv %s2357_s18  ;;  %s963_s22 = sshll.u32 %s532_s21, 4  ;;  %s2553_s18 = sld [smem:[#allocation31_spill]]  ;;  %s2428_s22 = int_to_ptr.vmem [resolvable:$true] %s963_s22 }
 0x121   : > { %v1444_v14 = vpop.eup %1443  ;;  %v839_v19 = vadd.f32 1.0, %v1442_v9  ;;  %v822_v32 = vadd.f32 %v821_v27, %v804_v25  ;;  %v835_v33 = vadd.f32 %v834_v29, %v808_v26  ;;  %v873_v37 = vstv %s2359_s0  ;;  %s1614_s13 = scalar_lea.vmem %s2428_s22, 128 }
 0x122   : > { %1447 = vrcp.f32 %v826_v13  ;;  %v852_v21 = vadd.f32 1.0, %v1444_v14  ;;  %v848_v34 = vadd.f32 %v847_v30, %v812_v28  ;;  %v861_v35 = vadd.f32 %v860_v31, %v816_v22  ;;  %p1615_p11 = scmp.ne.s32.totalorder %s2428_s22, %s1614_s13 }
 0x123   : > { %v1446_v23 = vpop.eup %1445  ;;  %1449 = vrcp.f32 %v839_v19  ;;  %v877_v38 = vstv %s2361_s27  ;;  %v881_v39 = vstv %s2363_s5  ;;  %v889_v40 = vstv %s2365_s1  ;;  %s2554_s5 = sld [smem:[#allocation40_spill]] }
 0x124   : > { %1451 = vrcp.f32 %v852_v21  ;;  %v865_v24 = vadd.f32 1.0, %v1446_v23  ;;  %v892_v41 = vstv %s2367_s2  ;;  %v896_v43 = vstv %s2369_s17  ;;  %s1728_s2 = smov [#allocation17]  }
 0x125   : > { %v900_v44 = vstv %s2371_s7  ;;  %v909_v45 = vstv %s2373_s30  ;;  %v912_v46 = vstv %s2375_s9  ;;  %v916_v49 = vstv %s2377_s19  ;;  %s1618_s17 = sshll.u32 %s1728_s2, 4  ;;  %s1619_s17 = int_to_ptr.vmem [resolvable:$false] %s1618_s17 }
 0x126   : > { %1453 = vrcp.f32 %v865_v24  ;;  %v920_v50 = vstv %s2379_s29  ;;  %v929_v51 = vstv %s2382_s12  ;;  %v932_v54 = vstv %s2384_s24  ;;  %p2555_p12 = scmp.ne.s32.totalorder %s2553_s18, 0  ;;  %s1620_s7 = scalar_lea.vmem %s1619_s17, 256 }
 0x127   : > { %v936_v55 = vstv %s2387_s15  ;;  %v940_v56 = vstv %s2389_s20  ;;  %v885_v19 = vstv %s2399_s25  ;;  %v904_v18 = vstv %s2405_s26  ;;  %p1621_p6 = scmp.lt.s32.totalorder %s2428_s22, %s1619_s17  ;;  %p1622_p7 = scmp.lt.s32.totalorder %s1620_s7, %s1614_s13 }
 0x128   : > { %v924_v20 = vstv %s2409_s14  ;;  %v944_v27 = vstv %s2415_s3  ;;  %p1616_p1 = pnand %p1615_p11, %p2555_p12 }
 0x129   : > { %s2426_s1 = scalar_lea.hbm %s2554_s5, %s1311_s23  ;;  %p1623_p10 = por %p1622_p7, %p1621_p6 }
 0x12a   : > { %p1617_p3 = pneg %p1616_p1 }
 0x12c   : > { %v1448_v42 = vpop.eup %1447  ;;  %p1624_p13 = pnand %p1623_p10, %p1617_p3 }
 0x12d   : > { %v1450_v47 = vpop.eup %1449  ;;  %v829_v48 = vmul.f32 %v1448_v42, %v822_v32 }
 0x12e   : > { %v1452_v52 = vpop.eup %1451  ;;  %v842_v53 = vmul.f32 %v1450_v47, %v835_v33 }
 0x12f   : > { %v855_v57 = vmul.f32 %v1452_v52, %v848_v34  ;;  %v871_v58 = vmul.f32 %v870_v36, %v829_v48  ;;  %v890_v59 = vmul.f32 %v889_v40, %v829_v48  ;;  %v910_v60 = vmul.f32 %v909_v45, %v829_v48 }
 0x130   : > { %v1454_v61 = vpop.eup %1453  ;;  %v874_v62 = vmul.f32 %v873_v37, %v842_v53  ;;  %v893_v63 = vmul.f32 %v892_v41, %v842_v53  ;;  %v913_v0 = vmul.f32 %v912_v46, %v842_v53  ;;  %v930_v1 = vmul.f32 %v929_v51, %v829_v48 }
 0x131   : > { %v868_v2 = vmul.f32 %v1454_v61, %v861_v35  ;;  %v878_v3 = vmul.f32 %v877_v38, %v855_v57  ;;  %v897_v4 = vmul.f32 %v896_v43, %v855_v57  ;;  %v917_v5 = vmul.f32 %v916_v49, %v855_v57 }
 0x132   : > { %v875_v6 = vadd.f32 %v874_v62, %v871_v58  ;;  %v894_v7 = vadd.f32 %v893_v63, %v890_v59  ;;  %v914_v8 = vadd.f32 %v913_v0, %v910_v60  ;;  %v933_v9 = vmul.f32 %v932_v54, %v842_v53 }
 0x133   : > { %v882_v10 = vmul.f32 %v881_v39, %v868_v2  ;;  %v901_v11 = vmul.f32 %v900_v44, %v868_v2  ;;  %v921_v12 = vmul.f32 %v920_v50, %v868_v2  ;;  %v937_v13 = vmul.f32 %v936_v55, %v855_v57 }
 0x134   : > { %v879_v14 = vadd.f32 %v878_v3, %v875_v6  ;;  %v898_v15 = vadd.f32 %v897_v4, %v894_v7  ;;  %v918_v16 = vadd.f32 %v917_v5, %v914_v8  ;;  %v934_v17 = vadd.f32 %v933_v9, %v930_v1 }
 0x135   : > { %v941_v21 = vmul.f32 %v940_v56, %v868_v2 }
 0x136   : > { %v883_v23 = vadd.f32 %v882_v10, %v879_v14  ;;  %v902_v24 = vadd.f32 %v901_v11, %v898_v15  ;;  %v922_v25 = vadd.f32 %v921_v12, %v918_v16  ;;  %v938_v26 = vadd.f32 %v937_v13, %v934_v17 }
 0x138   : > { %v886_v28 = vadd.f32 %v885_v19, %v883_v23  ;;  %v905_v22 = vadd.f32 %v904_v18, %v902_v24  ;;  %v925_v29 = vadd.f32 %v924_v20, %v922_v25  ;;  %v942_v30 = vadd.f32 %v941_v21, %v938_v26 }
 0x13a   : > { %887 = vst [vmem:[%s532_s21] sm:$0x3] %v886_v28  ;;  %1289 = vst [vmem:[%s532_s21 + $0x2] sm:$0x3] %v905_v22  ;;  %v945_v31 = vadd.f32 %v944_v27, %v942_v30 }
 0x13b   : > { %1295 = vst [vmem:[%s532_s21 + $0x4] sm:$0x3] %v925_v29 }
 0x13c   : > { %1301 = vst [vmem:[%s532_s21 + $0x6] sm:$0x3] %v945_v31 }
 0x13d   : > { %1627 = shalt.err (!%p1624_p13)
}
 0x13e   : > { %s1628_s30 = scalar_lea.hbm %s2426_s1, 128  ;;  %s1632_s29 = scalar_lea.hbm %s2554_s5, 256 }
 0x13f   : > { %p1629_p5 = scmp.ne.s32.totalorder %s2426_s1, %s1628_s30  ;;  %p1633_p8 = scmp.lt.u32.totalorder %s2426_s1, %s2554_s5 }
 0x140   : > { %p1634_p4 = scmp.lt.u32.totalorder %s1632_s29, %s1628_s30  ;;  %p1636_p11 = scmp.lt.u32.totalorder %s1628_s30, %s2426_s1 }
 0x141   : > { %p1630_p2 = pnand %p1629_p5, %p2555_p12 }
 0x142   : > { %p1635_p0 = por %p1634_p4, %p1633_p8 }
 0x143   : > { %p1631_p9 = pneg %p1630_p2 }
 0x144   : > { %p1637_p1 = por %p1636_p11, %p1635_p0 }
 0x146   : > { %p1638_p3 = pnand %p1637_p1, %p1631_p9 }
 0x148   : > { %1641 = shalt.err (!%p1638_p3)
}
 0x149   : > { %s1729_s15 = smov 32   ;;  %s1730_s20 = smov 2  }
 0x14a   : > { %1338 = dma.vmem_to_hbm [thread:$0]  (%p2555_p12), %s2428_s22, 128, %s2426_s1, %s949_s28, %s1729_s15, %s1729_s15, %s1730_s20  }
 0x14b PF: > { %s2556_s25 = sld [smem:[#allocation25_spill]]  ;;  %s2557_s26 = sld [smem:[#allocation33_spill]] }
 0x14c   : > { %s2558_s14 = sld [smem:[#allocation28_spill]] }
 0x151   : > { %s978_s3 = sand.u32 1, %s2556_s25   ;;  %p2559_p6 = scmp.ne.s32.totalorder %s2557_s26, 0 }
 0x152   : > { %p2560_p7 = scmp.ge.s32.totalorder %s2558_s14, 2  ;;  %s979_s23 = scalar_lea.sflag [#allocation4], %s978_s3 }
 0x154   : > { %p1367_p10 = pnand %p2560_p7, %p2559_p6 }
 0x156   : > { %1691 = dma.done.wait (!%p1367_p10), %s979_s23, 128  }
 0x157   : > { %1693 = vsyncadd (!%p1367_p10), %s979_s23, 4294967168  ;;  %s32_s14 = sadd.s32 1, %s2558_s14   ;;  %s2561_s21 = sld [smem:[#allocation32_spill]] }
 0x158   : > { %p29_p13 = scmp.ge.s32.totalorder %s32_s14, 4   ;;  %s2562_s12 = sld [smem:[#allocation27_spill]] }
 0x159   : > { %s2563_s13 = sld [smem:[#allocation29_spill]]  ;;  %s2564_s30 = smov %s1700_s10 }
 0x15a   : > { %s2565_s10 = smov %s1704_s11  ;;  %31 = sbr.rel (!%p29_p13) target bundleno = 20 (0x14), region = 165 }
 0x15d   : > { %s2566_s11 = smov %s2561_s21 }
 0x161   :  { %984 = vsyncpa [#allocation3], 1 }
 0x162   :  { %986 = vsyncpa [#allocation3 + $0x1], 1 }
 0x163   :  { %987 = vsyncpa [#allocation15], 1 }
 0x164   :  { %989 = vsyncpa [#allocation15 + $0x1], 1 }
 0x165   :  { %990 = vsyncpa [#allocation4], 1 }
 0x166   :  { %992 = vsyncpa [#allocation4 + $0x1], 1 }
 0x167   :  { %993 = vsyncpa [#allocation5], 1 }
 0x168   :  { %995 = vsyncpa [#allocation5 + $0x1], 1 }
 0x169   :  { %996 = vsyncpa [#allocation11], 1 }
 0x16a   :  { %997 = vsyncpa [#allocation6], 1 }
 0x16b   :  { %999 = vsyncpa [#allocation6 + $0x1], 1 }
 0x16c   :  { %1000 = vsyncpa [#allocation9], 1 }

</bundles_post_ra>
